<compile_context>
chip_gen: v5e
topology: v5e:2x2
jax: 0.10.0
libtpu: 0.0.40
codegen_flags: <defaults>
</compile_context>

<pallas_src>
import functools

import jax
import jax.numpy as jnp
import numpy as np
from jax.experimental import pallas as pl
from jax.experimental.pallas import tpu as pltpu

BN_EPS = 1e-5


def _round_up(x, m):
    return (x + m - 1) // m * m


def _pick_tile_n(n, max_tile_n, max_feat):
    """Largest lane tile (multiple of 128) fitting the per-generation VMEM
    budget; small-N cases collapse to a single tile."""
    max_tile_n = max(128, (max_tile_n // 128) * 128)
    n128 = _round_up(max(n, 1), 128)
    try:
        vmem_bytes = pltpu.get_tpu_info().vmem_capacity_bytes
    except Exception:  # interpret mode / older runtimes
        vmem_bytes = 64 << 20  # v7x per-core lower bound
    # Bytes per batch column: in+out activation blocks, double-buffered, f32.
    bytes_per_col = 4 * max_feat * 2 * 2
    budget = vmem_bytes // 8  # generous headroom for weights/stats/pipeline
    cap = max(128, (budget // bytes_per_col) // 128 * 128)
    return int(min(max_tile_n, cap, n128))


def _bn_affine(h, s, q, gamma, beta, inv_n):
    """Training-mode BatchNorm1d as one per-feature affine (feature-major)."""
    mean = s * inv_n
    var = jnp.maximum(q * inv_n - mean * mean, 0.0)
    # TODO(synk): switch to a centered second pass (or Welford) if the f32
    # E[x^2]-mean^2 cancellation ever becomes visible at large batch/width.
    scale = gamma * jax.lax.rsqrt(var + BN_EPS)
    shift = beta - mean * scale
    return h * scale + shift


def _first_layer_kernel(n_valid, tile_n, dot_dtype, x_ref, w_ref,
                        h_ref, sum_ref, sq_ref):
    """Linear(layer 0, bias-free) + masked batch-stat accumulation."""
    t = pl.program_id(0)

    @pl.when(t == 0)
    def _():
        sum_ref[...] = jnp.zeros_like(sum_ref)
        sq_ref[...] = jnp.zeros_like(sq_ref)

    h = jnp.dot(w_ref[...].astype(dot_dtype), x_ref[...].astype(dot_dtype),
                preferred_element_type=jnp.float32)           # (H0, tile_n)
    h_ref[...] = h

    # Zero padded batch columns (last tile only) before they enter the stats.
    col = jax.lax.broadcasted_iota(jnp.int32, h.shape, 1)
    hm = jnp.where(col < (n_valid - t * tile_n), h, 0.0)
    sum_ref[...] += jnp.sum(hm, axis=1, keepdims=True)
    sq_ref[...] += jnp.sum(hm * hm, axis=1, keepdims=True)


def _mid_layer_kernel(n_valid, tile_n, dot_dtype,
                      h_in_ref, sum_in_ref, sq_in_ref, g_ref, b_ref, w_ref,
                      h_ref, sum_ref, sq_ref):
    """BN(prev layer) + ReLU + Linear(this layer, bias-free) + stat accum."""
    t = pl.program_id(0)

    @pl.when(t == 0)
    def _():
        sum_ref[...] = jnp.zeros_like(sum_ref)
        sq_ref[...] = jnp.zeros_like(sq_ref)

    a = _bn_affine(h_in_ref[...], sum_in_ref[...], sq_in_ref[...],
                   g_ref[...], b_ref[...], 1.0 / n_valid)
    a = jnp.maximum(a, 0.0)                                   # ReLU
    h = jnp.dot(w_ref[...].astype(dot_dtype), a.astype(dot_dtype),
                preferred_element_type=jnp.float32)           # (Hl, tile_n)
    h_ref[...] = h

    col = jax.lax.broadcasted_iota(jnp.int32, h.shape, 1)
    hm = jnp.where(col < (n_valid - t * tile_n), h, 0.0)
    sum_ref[...] += jnp.sum(hm, axis=1, keepdims=True)
    sq_ref[...] += jnp.sum(hm * hm, axis=1, keepdims=True)


def _final_kernel(n_valid, z1_dim,
                  h_in_ref, sum_in_ref, sq_in_ref, g_ref, b_ref, out_ref):
    """BN(last layer, no ReLU); softplus only on the z1_dim 'scale' rows."""
    h = _bn_affine(h_in_ref[...], sum_in_ref[...], sq_in_ref[...],
                   g_ref[...], b_ref[...], 1.0 / n_valid)
    out_ref[:z1_dim, :] = h[:z1_dim, :]
    out_ref[z1_dim:, :] = jnp.logaddexp(h[z1_dim:, :], 0.0)   # softplus


def _stats_specs(h_dim):
    return [pl.BlockSpec((h_dim, 1), lambda t: (0, 0)),
            pl.BlockSpec((h_dim, 1), lambda t: (0, 0))]


def init_z1_encoder_params(key, num_labels, z1_dim, z2_dim, hidden_dims):
    """Deterministic init mirroring nn.Linear / nn.BatchNorm1d defaults."""
    dims = [num_labels + z2_dim] + list(hidden_dims) + [2 * z1_dim]
    params = []
    for in_dim, out_dim in zip(dims, dims[1:]):
        key, kw, kb = jax.random.split(key, 3)
        bound = 1.0 / np.sqrt(in_dim)
        w = jax.random.uniform(kw, (in_dim, out_dim), jnp.float32, -bound, bound)
        b = jax.random.uniform(kb, (1, out_dim), jnp.float32, -bound, bound)
        gamma = jnp.ones((1, out_dim), jnp.float32)    # BN weight default
        beta = jnp.zeros((1, out_dim), jnp.float32)    # BN bias default
        params.append((w, b, gamma, beta))
    return params


def z1_encoder_forward(params, z1_dim, z2, y, *, max_tile_n=1024,
                       dot_dtype=jnp.float32):
    """broadcast_inputs + cat + flatten glue in JAX, fused MLP in Pallas."""
    batch_shape = jnp.broadcast_shapes(z2.shape[:-1], y.shape[:-1])
    z2_b = jnp.broadcast_to(z2, batch_shape + z2.shape[-1:])
    y_b = jnp.broadcast_to(y, batch_shape + y.shape[-1:])
    # TODO(synk): fuse broadcast_inputs+concat into the first kernel by
    # splitting W0 into z2/y halves and projecting y once per data row.
    x = jnp.concatenate([z2_b, y_b], axis=-1)
    x2 = x.reshape(-1, x.shape[-1]).astype(jnp.float32)
    n = x2.shape[0]

    out_dims = [w.shape[1] for (w, _, _, _) in params]
    max_feat = max([params[0][0].shape[0]] + out_dims)
    tile_n = _pick_tile_n(n, max_tile_n, max_feat)
    n_pad = _round_up(n, tile_n)
    num_tiles = n_pad // tile_n

    # Feature-major input slab (F0, N_pad); zero-pad the batch (lane) axis.
    xT = x2.T.astype(dot_dtype)
    if n_pad != n:
        xT = jnp.pad(xT, ((0, 0), (0, n_pad - n)))

    wts = [jnp.asarray(w, jnp.float32).T for (w, _, _, _) in params]   # (out, in)
    gs = [jnp.asarray(g, jnp.float32).reshape(-1, 1) for (_, _, g, _) in params]
    bs = [jnp.asarray(be, jnp.float32).reshape(-1, 1) for (_, _, _, be) in params]
    num_layers = len(params)

    # Tile axis carries the BN-stat accumulator -> must be "arbitrary".
    acc_params = pltpu.CompilerParams(dimension_semantics=("arbitrary",))

    # --- sweep 0: Linear(layer 0) + stats(layer 0) ---------------------------
    f0, h0 = xT.shape[0], out_dims[0]
    h, s, q = pl.pallas_call(
        functools.partial(_first_layer_kernel, n, tile_n, dot_dtype),
        grid=(num_tiles,),
        in_specs=[pl.BlockSpec((f0, tile_n), lambda t: (0, t)),
                  pl.BlockSpec((h0, f0), lambda t: (0, 0))],
        out_specs=[pl.BlockSpec((h0, tile_n), lambda t: (0, t))] + _stats_specs(h0),
        out_shape=[jax.ShapeDtypeStruct((h0, n_pad), jnp.float32),
                   jax.ShapeDtypeStruct((h0, 1), jnp.float32),
                   jax.ShapeDtypeStruct((h0, 1), jnp.float32)],
        compiler_params=acc_params,
    )(xT, wts[0])

    # --- sweeps 1..L-1: BN(l-1)+ReLU+Linear(l)+stats(l), fused per sweep -----
    for l in range(1, num_layers):
        hin, hout = out_dims[l - 1], out_dims[l]
        h, s, q = pl.pallas_call(
            functools.partial(_mid_layer_kernel, n, tile_n, dot_dtype),
            grid=(num_tiles,),
            in_specs=[pl.BlockSpec((hin, tile_n), lambda t: (0, t))]
                     + _stats_specs(hin)
                     + [pl.BlockSpec((hin, 1), lambda t: (0, 0)),
                        pl.BlockSpec((hin, 1), lambda t: (0, 0)),
                        pl.BlockSpec((hout, hin), lambda t: (0, 0))],
            out_specs=[pl.BlockSpec((hout, tile_n), lambda t: (0, t))] + _stats_specs(hout),
            out_shape=[jax.ShapeDtypeStruct((hout, n_pad), jnp.float32),
                       jax.ShapeDtypeStruct((hout, 1), jnp.float32),
                       jax.ShapeDtypeStruct((hout, 1), jnp.float32)],
            compiler_params=acc_params,
        )(h, s, q, gs[l - 1], bs[l - 1], wts[l])

    # --- final sweep: BN(last, no ReLU) + softplus on scale rows -------------
    hlast = out_dims[-1]
    out_t = pl.pallas_call(
        functools.partial(_final_kernel, n, z1_dim),
        grid=(num_tiles,),
        in_specs=[pl.BlockSpec((hlast, tile_n), lambda t: (0, t))]
                 + _stats_specs(hlast)
                 + [pl.BlockSpec((hlast, 1), lambda t: (0, 0)),
                    pl.BlockSpec((hlast, 1), lambda t: (0, 0))],
        out_specs=pl.BlockSpec((hlast, tile_n), lambda t: (0, t)),
        out_shape=jax.ShapeDtypeStruct((hlast, n_pad), jnp.float32),
        compiler_params=pltpu.CompilerParams(dimension_semantics=("parallel",)),
    )(h, s, q, gs[-1], bs[-1])

    # Layout plumbing (transpose/split) done in XLA, outside the kernels.
    out = out_t[:, :n].T.reshape(batch_shape + (2 * z1_dim,))
    return out[..., :z1_dim], out[..., z1_dim:]


def z1_encoder_reference(params, z1_dim, z2, y):
    """Pure-JAX reference matching the PyTorch module (bias included)."""
    batch_shape = jnp.broadcast_shapes(z2.shape[:-1], y.shape[:-1])
    z2_b = jnp.broadcast_to(z2, batch_shape + z2.shape[-1:])
    y_b = jnp.broadcast_to(y, batch_shape + y.shape[-1:])
    x = jnp.concatenate([z2_b, y_b], axis=-1)
    h = x.reshape(-1, x.shape[-1]).astype(jnp.float32)
    for i, (w, b, g, beta) in enumerate(params):
        h = h @ w + b
        mean = jnp.mean(h, axis=0, keepdims=True)
        var = jnp.mean(jnp.square(h - mean), axis=0, keepdims=True)
        h = (h - mean) * jax.lax.rsqrt(var + BN_EPS) * g + beta
        if i < len(params) - 1:
            h = jnp.maximum(h, 0.0)
    loc = h[:, :z1_dim].reshape(batch_shape + (z1_dim,))
    scale = jax.nn.softplus(h[:, z1_dim:]).reshape(batch_shape + (z1_dim,))
    return loc, scale


if __name__ == "__main__":
    num_labels, z1_dim, z2_dim = 4, 8, 6
    hidden_dims = [32, 32]

    key = jax.random.PRNGKey(0)
    kp, kz, ky, kz2, ky2 = jax.random.split(key, 5)
    params = init_z1_encoder_params(kp, num_labels, z1_dim, z2_dim, hidden_dims)

    # Case 1: small shapes, single lane tile.  z2 has an extra particle dim,
    # y only the data-batch dim -> exercises broadcast_inputs.
    z2 = jax.random.normal(kz, (2, 8, z2_dim), jnp.float32)
    y = jax.nn.one_hot(jax.random.randint(ky, (8,), 0, num_labels),
                       num_labels, dtype=jnp.float32)

    fwd = jax.jit(functools.partial(z1_encoder_forward, params, z1_dim))
    loc, scale = fwd(z2, y)
    jax.block_until_ready((loc, scale))

    ref_loc, ref_scale = z1_encoder_reference(params, z1_dim, z2, y)
    np.testing.assert_allclose(np.asarray(loc), np.asarray(ref_loc),
                               rtol=2e-4, atol=2e-5)
    np.testing.assert_allclose(np.asarray(scale), np.asarray(ref_scale),
                               rtol=2e-4, atol=2e-5)
    assert loc.shape == (2, 8, z1_dim) and scale.shape == (2, 8, z1_dim)

    # Case 2: forces the multi-tile path (N=300 -> 3 lane tiles, last partial)
    # to exercise cross-tile BN stat accumulation and the padded-column mask.
    z2b = jax.random.normal(kz2, (2, 150, z2_dim), jnp.float32)
    yb = jax.nn.one_hot(jax.random.randint(ky2, (150,), 0, num_labels),
                        num_labels, dtype=jnp.float32)

    fwd_tiled = jax.jit(functools.partial(z1_encoder_forward, params, z1_dim,
                                          max_tile_n=128))
    loc2, scale2 = fwd_tiled(z2b, yb)
    jax.block_until_ready((loc2, scale2))

    ref_loc2, ref_scale2 = z1_encoder_reference(params, z1_dim, z2b, yb)
    np.testing.assert_allclose(np.asarray(loc2), np.asarray(ref_loc2),
                               rtol=2e-4, atol=2e-5)
    np.testing.assert_allclose(np.asarray(scale2), np.asarray(ref_scale2),
                               rtol=2e-4, atol=2e-5)

    print("KERNEL_OK")
</pallas_src>

<mosaic_0001>
module attributes {stable_mosaic.version = 11 : i64} {
  func.func @_first_layer_kernel(%arg0: i32, %arg1: memref<10x128xf32, #tpu.memory_space<vmem>>, %arg2: memref<32x10xf32, #tpu.memory_space<vmem>>, %arg3: memref<32x128xf32, #tpu.memory_space<vmem>>, %arg4: memref<32x1xf32, #tpu.memory_space<vmem>>, %arg5: memref<32x1xf32, #tpu.memory_space<vmem>>) attributes {dimension_semantics = [#tpu.dimension_semantics<arbitrary>], iteration_bounds = array<i64: 1>, scalar_prefetch = 0 : i64, scratch_operands = 0 : i64, tpu.core_type = #tpu.core_type<tc>, window_params = [{transform_indices = @transform_0, window_bounds = array<i64: 10, 128>}, {pipeline_mode = #tpu.pipeline_mode<synchronous>, transform_indices = @transform_1, window_bounds = array<i64: 32, 10>}, {transform_indices = @transform_2, window_bounds = array<i64: 32, 128>}, {pipeline_mode = #tpu.pipeline_mode<synchronous>, transform_indices = @transform_3, window_bounds = array<i64: 32, 1>}, {pipeline_mode = #tpu.pipeline_mode<synchronous>, transform_indices = @transform_4, window_bounds = array<i64: 32, 1>}]} {
    %c0_i32 = arith.constant 0 : i32
    %0 = arith.cmpi eq, %arg0, %c0_i32 : i32
    %1 = arith.extui %0 : i1 to i32
    %c0_i32_0 = arith.constant 0 : i32
    %2 = arith.cmpi ne, %1, %c0_i32_0 : i32
    scf.if %2 {
      %cst_17 = arith.constant 0.000000e+00 : f32
      %25 = vector.broadcast %cst_17 : f32 to vector<32x1xf32>
      %c0_18 = arith.constant 0 : index
      %c0_19 = arith.constant 0 : index
      %26 = vector.load %arg4[%c0_18, %c0_19] : memref<32x1xf32, #tpu.memory_space<vmem>>, vector<32x1xf32>
      tpu.vector_store %arg4[%c0_18, %c0_19], %25 {strides = array<i32>} : memref<32x1xf32, #tpu.memory_space<vmem>>, vector<32x1xf32>,
      %cst_20 = arith.constant 0.000000e+00 : f32
      %27 = vector.broadcast %cst_20 : f32 to vector<32x1xf32>
      %c0_21 = arith.constant 0 : index
      %c0_22 = arith.constant 0 : index
      %28 = vector.load %arg5[%c0_21, %c0_22] : memref<32x1xf32, #tpu.memory_space<vmem>>, vector<32x1xf32>
      tpu.vector_store %arg5[%c0_21, %c0_22], %27 {strides = array<i32>} : memref<32x1xf32, #tpu.memory_space<vmem>>, vector<32x1xf32>,
    } else {
    }
    %c0 = arith.constant 0 : index
    %c0_1 = arith.constant 0 : index
    %3 = vector.load %arg2[%c0, %c0_1] : memref<32x10xf32, #tpu.memory_space<vmem>>, vector<32x10xf32>
    %c0_2 = arith.constant 0 : index
    %c0_3 = arith.constant 0 : index
    %4 = vector.load %arg1[%c0_2, %c0_3] : memref<10x128xf32, #tpu.memory_space<vmem>>, vector<10x128xf32>
    %cst = arith.constant dense<0.000000e+00> : vector<32x128xf32>
    %5 = tpu.matmul %3, %4, %cst {dimension_numbers = #tpu.dot_dimension_numbers<[1], [0], [0], [1], [0, 0, 1, 1], [], []>} : vector<32x10xf32>, vector<10x128xf32>, vector<32x128xf32> -> vector<32x128xf32>
    %c0_4 = arith.constant 0 : index
    %c0_5 = arith.constant 0 : index
    %6 = vector.load %arg3[%c0_4, %c0_5] : memref<32x128xf32, #tpu.memory_space<vmem>>, vector<32x128xf32>
    tpu.vector_store %arg3[%c0_4, %c0_5], %5 {strides = array<i32>} : memref<32x128xf32, #tpu.memory_space<vmem>>, vector<32x128xf32>,
    %7 = tpu.iota {dimensions = array<i32: 1>} : vector<32x128xi32>
    %c128_i32 = arith.constant 128 : i32
    %8 = arith.muli %arg0, %c128_i32 : i32
    %c16_i32 = arith.constant 16 : i32
    %9 = arith.subi %c16_i32, %8 : i32
    %10 = vector.broadcast %9 : i32 to vector<32x128xi32>
    %11 = arith.cmpi slt, %7, %10 : vector<32x128xi32>
    %cst_6 = arith.constant 0.000000e+00 : f32
    %12 = vector.broadcast %cst_6 : f32 to vector<32x128xf32>
    %13 = arith.select %11, %5, %12 : vector<32x128xi1>, vector<32x128xf32>
    %c0_7 = arith.constant 0 : index
    %c0_8 = arith.constant 0 : index
    %14 = vector.load %arg4[%c0_7, %c0_8] : memref<32x1xf32, #tpu.memory_space<vmem>>, vector<32x1xf32>
    %cst_9 = arith.constant dense<0.000000e+00> : vector<32xf32>
    %15 = vector.multi_reduction <add>, %13, %cst_9 [1] : vector<32x128xf32> to vector<32xf32>
    %16 = vector.shape_cast %15 : vector<32xf32> to vector<32x1xf32>
    %17 = arith.addf %14, %16 : vector<32x1xf32>
    %c0_10 = arith.constant 0 : index
    %c0_11 = arith.constant 0 : index
    %18 = vector.load %arg4[%c0_10, %c0_11] : memref<32x1xf32, #tpu.memory_space<vmem>>, vector<32x1xf32>
    tpu.vector_store %arg4[%c0_10, %c0_11], %17 {strides = array<i32>} : memref<32x1xf32, #tpu.memory_space<vmem>>, vector<32x1xf32>,
    %c0_12 = arith.constant 0 : index
    %c0_13 = arith.constant 0 : index
    %19 = vector.load %arg5[%c0_12, %c0_13] : memref<32x1xf32, #tpu.memory_space<vmem>>, vector<32x1xf32>
    %20 = arith.mulf %13, %13 : vector<32x128xf32>
    %cst_14 = arith.constant dense<0.000000e+00> : vector<32xf32>
    %21 = vector.multi_reduction <add>, %20, %cst_14 [1] : vector<32x128xf32> to vector<32xf32>
    %22 = vector.shape_cast %21 : vector<32xf32> to vector<32x1xf32>
    %23 = arith.addf %19, %22 : vector<32x1xf32>
    %c0_15 = arith.constant 0 : index
    %c0_16 = arith.constant 0 : index
    %24 = vector.load %arg5[%c0_15, %c0_16] : memref<32x1xf32, #tpu.memory_space<vmem>>, vector<32x1xf32>
    tpu.vector_store %arg5[%c0_15, %c0_16], %23 {strides = array<i32>} : memref<32x1xf32, #tpu.memory_space<vmem>>, vector<32x1xf32>,
    return
  }
  func.func @transform_0(%arg0: i32) -> (i32, i32) {
    %c0_i32 = arith.constant 0 : i32
    %c0_i32_0 = arith.constant 0 : i32
    return %c0_i32, %arg0 : i32, i32
  }
  func.func @transform_1(%arg0: i32) -> (i32, i32) {
    %c0_i32 = arith.constant 0 : i32
    %c0_i32_0 = arith.constant 0 : i32
    %c0_i32_1 = arith.constant 0 : i32
    return %c0_i32, %c0_i32_0 : i32, i32
  }
  func.func @transform_2(%arg0: i32) -> (i32, i32) {
    %c0_i32 = arith.constant 0 : i32
    %c0_i32_0 = arith.constant 0 : i32
    return %c0_i32, %arg0 : i32, i32
  }
  func.func @transform_3(%arg0: i32) -> (i32, i32) {
    %c0_i32 = arith.constant 0 : i32
    %c0_i32_0 = arith.constant 0 : i32
    %c0_i32_1 = arith.constant 0 : i32
    return %c0_i32, %c0_i32_0 : i32, i32
  }
  func.func @transform_4(%arg0: i32) -> (i32, i32) {
    %c0_i32 = arith.constant 0 : i32
    %c0_i32_0 = arith.constant 0 : i32
    %c0_i32_1 = arith.constant 0 : i32
    return %c0_i32, %c0_i32_0 : i32, i32
  }
}

module attributes {stable_mosaic.version = 11 : i64} {
  func.func @_mid_layer_kernel(%arg0: i32, %arg1: memref<32x128xf32, #tpu.memory_space<vmem>>, %arg2: memref<32x1xf32, #tpu.memory_space<vmem>>, %arg3: memref<32x1xf32, #tpu.memory_space<vmem>>, %arg4: memref<32x1xf32, #tpu.memory_space<vmem>>, %arg5: memref<32x1xf32, #tpu.memory_space<vmem>>, %arg6: memref<32x32xf32, #tpu.memory_space<vmem>>, %arg7: memref<32x128xf32, #tpu.memory_space<vmem>>, %arg8: memref<32x1xf32, #tpu.memory_space<vmem>>, %arg9: memref<32x1xf32, #tpu.memory_space<vmem>>) attributes {dimension_semantics = [#tpu.dimension_semantics<arbitrary>], iteration_bounds = array<i64: 1>, scalar_prefetch = 0 : i64, scratch_operands = 0 : i64, tpu.core_type = #tpu.core_type<tc>, window_params = [{transform_indices = @transform_0, window_bounds = array<i64: 32, 128>}, {pipeline_mode = #tpu.pipeline_mode<synchronous>, transform_indices = @transform_1, window_bounds = array<i64: 32, 1>}, {pipeline_mode = #tpu.pipeline_mode<synchronous>, transform_indices = @transform_2, window_bounds = array<i64: 32, 1>}, {pipeline_mode = #tpu.pipeline_mode<synchronous>, transform_indices = @transform_3, window_bounds = array<i64: 32, 1>}, {pipeline_mode = #tpu.pipeline_mode<synchronous>, transform_indices = @transform_4, window_bounds = array<i64: 32, 1>}, {pipeline_mode = #tpu.pipeline_mode<synchronous>, transform_indices = @transform_5, window_bounds = array<i64: 32, 32>}, {transform_indices = @transform_6, window_bounds = array<i64: 32, 128>}, {pipeline_mode = #tpu.pipeline_mode<synchronous>, transform_indices = @transform_7, window_bounds = array<i64: 32, 1>}, {pipeline_mode = #tpu.pipeline_mode<synchronous>, transform_indices = @transform_8, window_bounds = array<i64: 32, 1>}]} {
    %c0_i32 = arith.constant 0 : i32
    %0 = arith.cmpi eq, %arg0, %c0_i32 : i32
    %1 = arith.extui %0 : i1 to i32
    %c0_i32_0 = arith.constant 0 : i32
    %2 = arith.cmpi ne, %1, %c0_i32_0 : i32
    scf.if %2 {
      %cst_30 = arith.constant 0.000000e+00 : f32
      %49 = vector.broadcast %cst_30 : f32 to vector<32x1xf32>
      %c0_31 = arith.constant 0 : index
      %c0_32 = arith.constant 0 : index
      %50 = vector.load %arg8[%c0_31, %c0_32] : memref<32x1xf32, #tpu.memory_space<vmem>>, vector<32x1xf32>
      tpu.vector_store %arg8[%c0_31, %c0_32], %49 {strides = array<i32>} : memref<32x1xf32, #tpu.memory_space<vmem>>, vector<32x1xf32>,
      %cst_33 = arith.constant 0.000000e+00 : f32
      %51 = vector.broadcast %cst_33 : f32 to vector<32x1xf32>
      %c0_34 = arith.constant 0 : index
      %c0_35 = arith.constant 0 : index
      %52 = vector.load %arg9[%c0_34, %c0_35] : memref<32x1xf32, #tpu.memory_space<vmem>>, vector<32x1xf32>
      tpu.vector_store %arg9[%c0_34, %c0_35], %51 {strides = array<i32>} : memref<32x1xf32, #tpu.memory_space<vmem>>, vector<32x1xf32>,
    } else {
    }
    %c0 = arith.constant 0 : index
    %c0_1 = arith.constant 0 : index
    %3 = vector.load %arg1[%c0, %c0_1] : memref<32x128xf32, #tpu.memory_space<vmem>>, vector<32x128xf32>
    %c0_2 = arith.constant 0 : index
    %c0_3 = arith.constant 0 : index
    %4 = vector.load %arg2[%c0_2, %c0_3] : memref<32x1xf32, #tpu.memory_space<vmem>>, vector<32x1xf32>
    %c0_4 = arith.constant 0 : index
    %c0_5 = arith.constant 0 : index
    %5 = vector.load %arg3[%c0_4, %c0_5] : memref<32x1xf32, #tpu.memory_space<vmem>>, vector<32x1xf32>
    %c0_6 = arith.constant 0 : index
    %c0_7 = arith.constant 0 : index
    %6 = vector.load %arg4[%c0_6, %c0_7] : memref<32x1xf32, #tpu.memory_space<vmem>>, vector<32x1xf32>
    %c0_8 = arith.constant 0 : index
    %c0_9 = arith.constant 0 : index
    %7 = vector.load %arg5[%c0_8, %c0_9] : memref<32x1xf32, #tpu.memory_space<vmem>>, vector<32x1xf32>
    %cst = arith.constant 6.250000e-02 : f32
    %8 = vector.broadcast %cst : f32 to vector<32x1xf32>
    %9 = arith.mulf %4, %8 : vector<32x1xf32>
    %cst_10 = arith.constant 6.250000e-02 : f32
    %10 = vector.broadcast %cst_10 : f32 to vector<32x1xf32>
    %11 = arith.mulf %5, %10 : vector<32x1xf32>
    %12 = arith.mulf %9, %9 : vector<32x1xf32>
    %13 = arith.subf %11, %12 : vector<32x1xf32>
    %cst_11 = arith.constant 0.000000e+00 : f32
    %14 = vector.broadcast %cst_11 : f32 to vector<32x1xf32>
    %15 = arith.maximumf %13, %14 : vector<32x1xf32>
    %cst_12 = arith.constant 9.99999974E-6 : f32
    %16 = vector.broadcast %cst_12 : f32 to vector<32x1xf32>
    %17 = arith.addf %15, %16 : vector<32x1xf32>
    %18 = math.rsqrt %17 : vector<32x1xf32>
    %19 = arith.mulf %6, %18 : vector<32x1xf32>
    %20 = arith.mulf %9, %19 : vector<32x1xf32>
    %21 = arith.subf %7, %20 : vector<32x1xf32>
    %22 = vector.broadcast %19 : vector<32x1xf32> to vector<32x128xf32>
    %23 = arith.mulf %3, %22 : vector<32x128xf32>
    %24 = vector.broadcast %21 : vector<32x1xf32> to vector<32x128xf32>
    %25 = arith.addf %23, %24 : vector<32x128xf32>
    %cst_13 = arith.constant 0.000000e+00 : f32
    %26 = vector.broadcast %cst_13 : f32 to vector<32x128xf32>
    %27 = arith.maximumf %25, %26 : vector<32x128xf32>
    %c0_14 = arith.constant 0 : index
    %c0_15 = arith.constant 0 : index
    %28 = vector.load %arg6[%c0_14, %c0_15] : memref<32x32xf32, #tpu.memory_space<vmem>>, vector<32x32xf32>
    %cst_16 = arith.constant dense<0.000000e+00> : vector<32x128xf32>
    %29 = tpu.matmul %28, %27, %cst_16 {dimension_numbers = #tpu.dot_dimension_numbers<[1], [0], [0], [1], [0, 0, 1, 1], [], []>} : vector<32x32xf32>, vector<32x128xf32>, vector<32x128xf32> -> vector<32x128xf32>
    %c0_17 = arith.constant 0 : index
    %c0_18 = arith.constant 0 : index
    %30 = vector.load %arg7[%c0_17, %c0_18] : memref<32x128xf32, #tpu.memory_space<vmem>>, vector<32x128xf32>
    tpu.vector_store %arg7[%c0_17, %c0_18], %29 {strides = array<i32>} : memref<32x128xf32, #tpu.memory_space<vmem>>, vector<32x128xf32>,
    %31 = tpu.iota {dimensions = array<i32: 1>} : vector<32x128xi32>
    %c128_i32 = arith.constant 128 : i32
    %32 = arith.muli %arg0, %c128_i32 : i32
    %c16_i32 = arith.constant 16 : i32
    %33 = arith.subi %c16_i32, %32 : i32
    %34 = vector.broadcast %33 : i32 to vector<32x128xi32>
    %35 = arith.cmpi slt, %31, %34 : vector<32x128xi32>
    %cst_19 = arith.constant 0.000000e+00 : f32
    %36 = vector.broadcast %cst_19 : f32 to vector<32x128xf32>
    %37 = arith.select %35, %29, %36 : vector<32x128xi1>, vector<32x128xf32>
    %c0_20 = arith.constant 0 : index
    %c0_21 = arith.constant 0 : index
    %38 = vector.load %arg8[%c0_20, %c0_21] : memref<32x1xf32, #tpu.memory_space<vmem>>, vector<32x1xf32>
    %cst_22 = arith.constant dense<0.000000e+00> : vector<32xf32>
    %39 = vector.multi_reduction <add>, %37, %cst_22 [1] : vector<32x128xf32> to vector<32xf32>
    %40 = vector.shape_cast %39 : vector<32xf32> to vector<32x1xf32>
    %41 = arith.addf %38, %40 : vector<32x1xf32>
    %c0_23 = arith.constant 0 : index
    %c0_24 = arith.constant 0 : index
    %42 = vector.load %arg8[%c0_23, %c0_24] : memref<32x1xf32, #tpu.memory_space<vmem>>, vector<32x1xf32>
    tpu.vector_store %arg8[%c0_23, %c0_24], %41 {strides = array<i32>} : memref<32x1xf32, #tpu.memory_space<vmem>>, vector<32x1xf32>,
    %c0_25 = arith.constant 0 : index
    %c0_26 = arith.constant 0 : index
    %43 = vector.load %arg9[%c0_25, %c0_26] : memref<32x1xf32, #tpu.memory_space<vmem>>, vector<32x1xf32>
    %44 = arith.mulf %37, %37 : vector<32x128xf32>
    %cst_27 = arith.constant dense<0.000000e+00> : vector<32xf32>
    %45 = vector.multi_reduction <add>, %44, %cst_27 [1] : vector<32x128xf32> to vector<32xf32>
    %46 = vector.shape_cast %45 : vector<32xf32> to vector<32x1xf32>
    %47 = arith.addf %43, %46 : vector<32x1xf32>
    %c0_28 = arith.constant 0 : index
    %c0_29 = arith.constant 0 : index
    %48 = vector.load %arg9[%c0_28, %c0_29] : memref<32x1xf32, #tpu.memory_space<vmem>>, vector<32x1xf32>
    tpu.vector_store %arg9[%c0_28, %c0_29], %47 {strides = array<i32>} : memref<32x1xf32, #tpu.memory_space<vmem>>, vector<32x1xf32>,
    return
  }
  func.func @transform_0(%arg0: i32) -> (i32, i32) {
    %c0_i32 = arith.constant 0 : i32
    %c0_i32_0 = arith.constant 0 : i32
    return %c0_i32, %arg0 : i32, i32
  }
  func.func @transform_1(%arg0: i32) -> (i32, i32) {
    %c0_i32 = arith.constant 0 : i32
    %c0_i32_0 = arith.constant 0 : i32
    %c0_i32_1 = arith.constant 0 : i32
    return %c0_i32, %c0_i32_0 : i32, i32
  }
  func.func @transform_2(%arg0: i32) -> (i32, i32) {
    %c0_i32 = arith.constant 0 : i32
    %c0_i32_0 = arith.constant 0 : i32
    %c0_i32_1 = arith.constant 0 : i32
    return %c0_i32, %c0_i32_0 : i32, i32
  }
  func.func @transform_3(%arg0: i32) -> (i32, i32) {
    %c0_i32 = arith.constant 0 : i32
    %c0_i32_0 = arith.constant 0 : i32
    %c0_i32_1 = arith.constant 0 : i32
    return %c0_i32, %c0_i32_0 : i32, i32
  }
  func.func @transform_4(%arg0: i32) -> (i32, i32) {
    %c0_i32 = arith.constant 0 : i32
    %c0_i32_0 = arith.constant 0 : i32
    %c0_i32_1 = arith.constant 0 : i32
    return %c0_i32, %c0_i32_0 : i32, i32
  }
  func.func @transform_5(%arg0: i32) -> (i32, i32) {
    %c0_i32 = arith.constant 0 : i32
    %c0_i32_0 = arith.constant 0 : i32
    %c0_i32_1 = arith.constant 0 : i32
    return %c0_i32, %c0_i32_0 : i32, i32
  }
  func.func @transform_6(%arg0: i32) -> (i32, i32) {
    %c0_i32 = arith.constant 0 : i32
    %c0_i32_0 = arith.constant 0 : i32
    return %c0_i32, %arg0 : i32, i32
  }
  func.func @transform_7(%arg0: i32) -> (i32, i32) {
    %c0_i32 = arith.constant 0 : i32
    %c0_i32_0 = arith.constant 0 : i32
    %c0_i32_1 = arith.constant 0 : i32
    return %c0_i32, %c0_i32_0 : i32, i32
  }
  func.func @transform_8(%arg0: i32) -> (i32, i32) {
    %c0_i32 = arith.constant 0 : i32
    %c0_i32_0 = arith.constant 0 : i32
    %c0_i32_1 = arith.constant 0 : i32
    return %c0_i32, %c0_i32_0 : i32, i32
  }
}

module attributes {stable_mosaic.version = 11 : i64} {
  func.func @_final_kernel(%arg0: i32, %arg1: memref<16x128xf32, #tpu.memory_space<vmem>>, %arg2: memref<16x1xf32, #tpu.memory_space<vmem>>, %arg3: memref<16x1xf32, #tpu.memory_space<vmem>>, %arg4: memref<16x1xf32, #tpu.memory_space<vmem>>, %arg5: memref<16x1xf32, #tpu.memory_space<vmem>>, %arg6: memref<16x128xf32, #tpu.memory_space<vmem>>) attributes {dimension_semantics = [#tpu.dimension_semantics<parallel>], iteration_bounds = array<i64: 1>, scalar_prefetch = 0 : i64, scratch_operands = 0 : i64, tpu.core_type = #tpu.core_type<tc>, window_params = [{transform_indices = @transform_0, window_bounds = array<i64: 16, 128>}, {pipeline_mode = #tpu.pipeline_mode<synchronous>, transform_indices = @transform_1, window_bounds = array<i64: 16, 1>}, {pipeline_mode = #tpu.pipeline_mode<synchronous>, transform_indices = @transform_2, window_bounds = array<i64: 16, 1>}, {pipeline_mode = #tpu.pipeline_mode<synchronous>, transform_indices = @transform_3, window_bounds = array<i64: 16, 1>}, {pipeline_mode = #tpu.pipeline_mode<synchronous>, transform_indices = @transform_4, window_bounds = array<i64: 16, 1>}, {transform_indices = @transform_5, window_bounds = array<i64: 16, 128>}]} {
    %c0 = arith.constant 0 : index
    %c0_0 = arith.constant 0 : index
    %0 = vector.load %arg1[%c0, %c0_0] : memref<16x128xf32, #tpu.memory_space<vmem>>, vector<16x128xf32>
    %c0_1 = arith.constant 0 : index
    %c0_2 = arith.constant 0 : index
    %1 = vector.load %arg2[%c0_1, %c0_2] : memref<16x1xf32, #tpu.memory_space<vmem>>, vector<16x1xf32>
    %c0_3 = arith.constant 0 : index
    %c0_4 = arith.constant 0 : index
    %2 = vector.load %arg3[%c0_3, %c0_4] : memref<16x1xf32, #tpu.memory_space<vmem>>, vector<16x1xf32>
    %c0_5 = arith.constant 0 : index
    %c0_6 = arith.constant 0 : index
    %3 = vector.load %arg4[%c0_5, %c0_6] : memref<16x1xf32, #tpu.memory_space<vmem>>, vector<16x1xf32>
    %c0_7 = arith.constant 0 : index
    %c0_8 = arith.constant 0 : index
    %4 = vector.load %arg5[%c0_7, %c0_8] : memref<16x1xf32, #tpu.memory_space<vmem>>, vector<16x1xf32>
    %cst = arith.constant 6.250000e-02 : f32
    %5 = vector.broadcast %cst : f32 to vector<16x1xf32>
    %6 = arith.mulf %1, %5 : vector<16x1xf32>
    %cst_9 = arith.constant 6.250000e-02 : f32
    %7 = vector.broadcast %cst_9 : f32 to vector<16x1xf32>
    %8 = arith.mulf %2, %7 : vector<16x1xf32>
    %9 = arith.mulf %6, %6 : vector<16x1xf32>
    %10 = arith.subf %8, %9 : vector<16x1xf32>
    %cst_10 = arith.constant 0.000000e+00 : f32
    %11 = vector.broadcast %cst_10 : f32 to vector<16x1xf32>
    %12 = arith.maximumf %10, %11 : vector<16x1xf32>
    %cst_11 = arith.constant 9.99999974E-6 : f32
    %13 = vector.broadcast %cst_11 : f32 to vector<16x1xf32>
    %14 = arith.addf %12, %13 : vector<16x1xf32>
    %15 = math.rsqrt %14 : vector<16x1xf32>
    %16 = arith.mulf %3, %15 : vector<16x1xf32>
    %17 = arith.mulf %6, %16 : vector<16x1xf32>
    %18 = arith.subf %4, %17 : vector<16x1xf32>
    %19 = vector.broadcast %16 : vector<16x1xf32> to vector<16x128xf32>
    %20 = arith.mulf %0, %19 : vector<16x128xf32>
    %21 = vector.broadcast %18 : vector<16x1xf32> to vector<16x128xf32>
    %22 = arith.addf %20, %21 : vector<16x128xf32>
    %23 = vector.extract_strided_slice %22 {offsets = [0, 0], sizes = [8, 128], strides = [1, 1]} : vector<16x128xf32> to vector<8x128xf32>
    %c0_12 = arith.constant 0 : index
    %c0_13 = arith.constant 0 : index
    %24 = vector.load %arg6[%c0_12, %c0_13] : memref<16x128xf32, #tpu.memory_space<vmem>>, vector<8x128xf32>
    tpu.vector_store %arg6[%c0_12, %c0_13], %23 {strides = array<i32>} : memref<16x128xf32, #tpu.memory_space<vmem>>, vector<8x128xf32>,
    %25 = vector.extract_strided_slice %22 {offsets = [8, 0], sizes = [8, 128], strides = [1, 1]} : vector<16x128xf32> to vector<8x128xf32>
    %cst_14 = arith.constant 0.000000e+00 : f32
    %26 = vector.broadcast %cst_14 : f32 to vector<8x128xf32>
    %27 = arith.maximumf %25, %26 : vector<8x128xf32>
    %28 = vector.broadcast %cst_14 : f32 to vector<8x128xf32>
    %29 = arith.subf %25, %28 : vector<8x128xf32>
    %30 = arith.cmpf one, %29, %29 : vector<8x128xf32>
    %31 = vector.broadcast %cst_14 : f32 to vector<8x128xf32>
    %32 = arith.addf %25, %31 : vector<8x128xf32>
    %33 = math.absf %29 : vector<8x128xf32>
    %cst_15 = arith.constant 0.000000e+00 : f32
    %34 = vector.broadcast %cst_15 : f32 to vector<8x128xf32>
    %35 = arith.subf %34, %33 : vector<8x128xf32>
    %36 = math.exp %35 : vector<8x128xf32>
    %37 = math.log1p %36 : vector<8x128xf32>
    %38 = arith.addf %27, %37 : vector<8x128xf32>
    %39 = arith.select %30, %32, %38 : vector<8x128xi1>, vector<8x128xf32>
    %c8 = arith.constant 8 : index
    %c0_16 = arith.constant 0 : index
    %40 = vector.load %arg6[%c8, %c0_16] : memref<16x128xf32, #tpu.memory_space<vmem>>, vector<8x128xf32>
    tpu.vector_store %arg6[%c8, %c0_16], %39 {strides = array<i32>} : memref<16x128xf32, #tpu.memory_space<vmem>>, vector<8x128xf32>,
    return
  }
  func.func @transform_0(%arg0: i32) -> (i32, i32) {
    %c0_i32 = arith.constant 0 : i32
    %c0_i32_0 = arith.constant 0 : i32
    return %c0_i32, %arg0 : i32, i32
  }
  func.func @transform_1(%arg0: i32) -> (i32, i32) {
    %c0_i32 = arith.constant 0 : i32
    %c0_i32_0 = arith.constant 0 : i32
    %c0_i32_1 = arith.constant 0 : i32
    return %c0_i32, %c0_i32_0 : i32, i32
  }
  func.func @transform_2(%arg0: i32) -> (i32, i32) {
    %c0_i32 = arith.constant 0 : i32
    %c0_i32_0 = arith.constant 0 : i32
    %c0_i32_1 = arith.constant 0 : i32
    return %c0_i32, %c0_i32_0 : i32, i32
  }
  func.func @transform_3(%arg0: i32) -> (i32, i32) {
    %c0_i32 = arith.constant 0 : i32
    %c0_i32_0 = arith.constant 0 : i32
    %c0_i32_1 = arith.constant 0 : i32
    return %c0_i32, %c0_i32_0 : i32, i32
  }
  func.func @transform_4(%arg0: i32) -> (i32, i32) {
    %c0_i32 = arith.constant 0 : i32
    %c0_i32_0 = arith.constant 0 : i32
    %c0_i32_1 = arith.constant 0 : i32
    return %c0_i32, %c0_i32_0 : i32, i32
  }
  func.func @transform_5(%arg0: i32) -> (i32, i32) {
    %c0_i32 = arith.constant 0 : i32
    %c0_i32_0 = arith.constant 0 : i32
    return %c0_i32, %arg0 : i32, i32
  }
}

module attributes {stable_mosaic.version = 11 : i64} {
  func.func @_mid_layer_kernel(%arg0: i32, %arg1: memref<32x128xf32, #tpu.memory_space<vmem>>, %arg2: memref<32x1xf32, #tpu.memory_space<vmem>>, %arg3: memref<32x1xf32, #tpu.memory_space<vmem>>, %arg4: memref<32x1xf32, #tpu.memory_space<vmem>>, %arg5: memref<32x1xf32, #tpu.memory_space<vmem>>, %arg6: memref<16x32xf32, #tpu.memory_space<vmem>>, %arg7: memref<16x128xf32, #tpu.memory_space<vmem>>, %arg8: memref<16x1xf32, #tpu.memory_space<vmem>>, %arg9: memref<16x1xf32, #tpu.memory_space<vmem>>) attributes {dimension_semantics = [#tpu.dimension_semantics<arbitrary>], iteration_bounds = array<i64: 1>, scalar_prefetch = 0 : i64, scratch_operands = 0 : i64, tpu.core_type = #tpu.core_type<tc>, window_params = [{transform_indices = @transform_0, window_bounds = array<i64: 32, 128>}, {pipeline_mode = #tpu.pipeline_mode<synchronous>, transform_indices = @transform_1, window_bounds = array<i64: 32, 1>}, {pipeline_mode = #tpu.pipeline_mode<synchronous>, transform_indices = @transform_2, window_bounds = array<i64: 32, 1>}, {pipeline_mode = #tpu.pipeline_mode<synchronous>, transform_indices = @transform_3, window_bounds = array<i64: 32, 1>}, {pipeline_mode = #tpu.pipeline_mode<synchronous>, transform_indices = @transform_4, window_bounds = array<i64: 32, 1>}, {pipeline_mode = #tpu.pipeline_mode<synchronous>, transform_indices = @transform_5, window_bounds = array<i64: 16, 32>}, {transform_indices = @transform_6, window_bounds = array<i64: 16, 128>}, {pipeline_mode = #tpu.pipeline_mode<synchronous>, transform_indices = @transform_7, window_bounds = array<i64: 16, 1>}, {pipeline_mode = #tpu.pipeline_mode<synchronous>, transform_indices = @transform_8, window_bounds = array<i64: 16, 1>}]} {
    %c0_i32 = arith.constant 0 : i32
    %0 = arith.cmpi eq, %arg0, %c0_i32 : i32
    %1 = arith.extui %0 : i1 to i32
    %c0_i32_0 = arith.constant 0 : i32
    %2 = arith.cmpi ne, %1, %c0_i32_0 : i32
    scf.if %2 {
      %cst_30 = arith.constant 0.000000e+00 : f32
      %49 = vector.broadcast %cst_30 : f32 to vector<16x1xf32>
      %c0_31 = arith.constant 0 : index
      %c0_32 = arith.constant 0 : index
      %50 = vector.load %arg8[%c0_31, %c0_32] : memref<16x1xf32, #tpu.memory_space<vmem>>, vector<16x1xf32>
      tpu.vector_store %arg8[%c0_31, %c0_32], %49 {strides = array<i32>} : memref<16x1xf32, #tpu.memory_space<vmem>>, vector<16x1xf32>,
      %cst_33 = arith.constant 0.000000e+00 : f32
      %51 = vector.broadcast %cst_33 : f32 to vector<16x1xf32>
      %c0_34 = arith.constant 0 : index
      %c0_35 = arith.constant 0 : index
      %52 = vector.load %arg9[%c0_34, %c0_35] : memref<16x1xf32, #tpu.memory_space<vmem>>, vector<16x1xf32>
      tpu.vector_store %arg9[%c0_34, %c0_35], %51 {strides = array<i32>} : memref<16x1xf32, #tpu.memory_space<vmem>>, vector<16x1xf32>,
    } else {
    }
    %c0 = arith.constant 0 : index
    %c0_1 = arith.constant 0 : index
    %3 = vector.load %arg1[%c0, %c0_1] : memref<32x128xf32, #tpu.memory_space<vmem>>, vector<32x128xf32>
    %c0_2 = arith.constant 0 : index
    %c0_3 = arith.constant 0 : index
    %4 = vector.load %arg2[%c0_2, %c0_3] : memref<32x1xf32, #tpu.memory_space<vmem>>, vector<32x1xf32>
    %c0_4 = arith.constant 0 : index
    %c0_5 = arith.constant 0 : index
    %5 = vector.load %arg3[%c0_4, %c0_5] : memref<32x1xf32, #tpu.memory_space<vmem>>, vector<32x1xf32>
    %c0_6 = arith.constant 0 : index
    %c0_7 = arith.constant 0 : index
    %6 = vector.load %arg4[%c0_6, %c0_7] : memref<32x1xf32, #tpu.memory_space<vmem>>, vector<32x1xf32>
    %c0_8 = arith.constant 0 : index
    %c0_9 = arith.constant 0 : index
    %7 = vector.load %arg5[%c0_8, %c0_9] : memref<32x1xf32, #tpu.memory_space<vmem>>, vector<32x1xf32>
    %cst = arith.constant 6.250000e-02 : f32
    %8 = vector.broadcast %cst : f32 to vector<32x1xf32>
    %9 = arith.mulf %4, %8 : vector<32x1xf32>
    %cst_10 = arith.constant 6.250000e-02 : f32
    %10 = vector.broadcast %cst_10 : f32 to vector<32x1xf32>
    %11 = arith.mulf %5, %10 : vector<32x1xf32>
    %12 = arith.mulf %9, %9 : vector<32x1xf32>
    %13 = arith.subf %11, %12 : vector<32x1xf32>
    %cst_11 = arith.constant 0.000000e+00 : f32
    %14 = vector.broadcast %cst_11 : f32 to vector<32x1xf32>
    %15 = arith.maximumf %13, %14 : vector<32x1xf32>
    %cst_12 = arith.constant 9.99999974E-6 : f32
    %16 = vector.broadcast %cst_12 : f32 to vector<32x1xf32>
    %17 = arith.addf %15, %16 : vector<32x1xf32>
    %18 = math.rsqrt %17 : vector<32x1xf32>
    %19 = arith.mulf %6, %18 : vector<32x1xf32>
    %20 = arith.mulf %9, %19 : vector<32x1xf32>
    %21 = arith.subf %7, %20 : vector<32x1xf32>
    %22 = vector.broadcast %19 : vector<32x1xf32> to vector<32x128xf32>
    %23 = arith.mulf %3, %22 : vector<32x128xf32>
    %24 = vector.broadcast %21 : vector<32x1xf32> to vector<32x128xf32>
    %25 = arith.addf %23, %24 : vector<32x128xf32>
    %cst_13 = arith.constant 0.000000e+00 : f32
    %26 = vector.broadcast %cst_13 : f32 to vector<32x128xf32>
    %27 = arith.maximumf %25, %26 : vector<32x128xf32>
    %c0_14 = arith.constant 0 : index
    %c0_15 = arith.constant 0 : index
    %28 = vector.load %arg6[%c0_14, %c0_15] : memref<16x32xf32, #tpu.memory_space<vmem>>, vector<16x32xf32>
    %cst_16 = arith.constant dense<0.000000e+00> : vector<16x128xf32>
    %29 = tpu.matmul %28, %27, %cst_16 {dimension_numbers = #tpu.dot_dimension_numbers<[1], [0], [0], [1], [0, 0, 1, 1], [], []>} : vector<16x32xf32>, vector<32x128xf32>, vector<16x128xf32> -> vector<16x128xf32>
    %c0_17 = arith.constant 0 : index
    %c0_18 = arith.constant 0 : index
    %30 = vector.load %arg7[%c0_17, %c0_18] : memref<16x128xf32, #tpu.memory_space<vmem>>, vector<16x128xf32>
    tpu.vector_store %arg7[%c0_17, %c0_18], %29 {strides = array<i32>} : memref<16x128xf32, #tpu.memory_space<vmem>>, vector<16x128xf32>,
    %31 = tpu.iota {dimensions = array<i32: 1>} : vector<16x128xi32>
    %c128_i32 = arith.constant 128 : i32
    %32 = arith.muli %arg0, %c128_i32 : i32
    %c16_i32 = arith.constant 16 : i32
    %33 = arith.subi %c16_i32, %32 : i32
    %34 = vector.broadcast %33 : i32 to vector<16x128xi32>
    %35 = arith.cmpi slt, %31, %34 : vector<16x128xi32>
    %cst_19 = arith.constant 0.000000e+00 : f32
    %36 = vector.broadcast %cst_19 : f32 to vector<16x128xf32>
    %37 = arith.select %35, %29, %36 : vector<16x128xi1>, vector<16x128xf32>
    %c0_20 = arith.constant 0 : index
    %c0_21 = arith.constant 0 : index
    %38 = vector.load %arg8[%c0_20, %c0_21] : memref<16x1xf32, #tpu.memory_space<vmem>>, vector<16x1xf32>
    %cst_22 = arith.constant dense<0.000000e+00> : vector<16xf32>
    %39 = vector.multi_reduction <add>, %37, %cst_22 [1] : vector<16x128xf32> to vector<16xf32>
    %40 = vector.shape_cast %39 : vector<16xf32> to vector<16x1xf32>
    %41 = arith.addf %38, %40 : vector<16x1xf32>
    %c0_23 = arith.constant 0 : index
    %c0_24 = arith.constant 0 : index
    %42 = vector.load %arg8[%c0_23, %c0_24] : memref<16x1xf32, #tpu.memory_space<vmem>>, vector<16x1xf32>
    tpu.vector_store %arg8[%c0_23, %c0_24], %41 {strides = array<i32>} : memref<16x1xf32, #tpu.memory_space<vmem>>, vector<16x1xf32>,
    %c0_25 = arith.constant 0 : index
    %c0_26 = arith.constant 0 : index
    %43 = vector.load %arg9[%c0_25, %c0_26] : memref<16x1xf32, #tpu.memory_space<vmem>>, vector<16x1xf32>
    %44 = arith.mulf %37, %37 : vector<16x128xf32>
    %cst_27 = arith.constant dense<0.000000e+00> : vector<16xf32>
    %45 = vector.multi_reduction <add>, %44, %cst_27 [1] : vector<16x128xf32> to vector<16xf32>
    %46 = vector.shape_cast %45 : vector<16xf32> to vector<16x1xf32>
    %47 = arith.addf %43, %46 : vector<16x1xf32>
    %c0_28 = arith.constant 0 : index
    %c0_29 = arith.constant 0 : index
    %48 = vector.load %arg9[%c0_28, %c0_29] : memref<16x1xf32, #tpu.memory_space<vmem>>, vector<16x1xf32>
    tpu.vector_store %arg9[%c0_28, %c0_29], %47 {strides = array<i32>} : memref<16x1xf32, #tpu.memory_space<vmem>>, vector<16x1xf32>,
    return
  }
  func.func @transform_0(%arg0: i32) -> (i32, i32) {
    %c0_i32 = arith.constant 0 : i32
    %c0_i32_0 = arith.constant 0 : i32
    return %c0_i32, %arg0 : i32, i32
  }
  func.func @transform_1(%arg0: i32) -> (i32, i32) {
    %c0_i32 = arith.constant 0 : i32
    %c0_i32_0 = arith.constant 0 : i32
    %c0_i32_1 = arith.constant 0 : i32
    return %c0_i32, %c0_i32_0 : i32, i32
  }
  func.func @transform_2(%arg0: i32) -> (i32, i32) {
    %c0_i32 = arith.constant 0 : i32
    %c0_i32_0 = arith.constant 0 : i32
    %c0_i32_1 = arith.constant 0 : i32
    return %c0_i32, %c0_i32_0 : i32, i32
  }
  func.func @transform_3(%arg0: i32) -> (i32, i32) {
    %c0_i32 = arith.constant 0 : i32
    %c0_i32_0 = arith.constant 0 : i32
    %c0_i32_1 = arith.constant 0 : i32
    return %c0_i32, %c0_i32_0 : i32, i32
  }
  func.func @transform_4(%arg0: i32) -> (i32, i32) {
    %c0_i32 = arith.constant 0 : i32
    %c0_i32_0 = arith.constant 0 : i32
    %c0_i32_1 = arith.constant 0 : i32
    return %c0_i32, %c0_i32_0 : i32, i32
  }
  func.func @transform_5(%arg0: i32) -> (i32, i32) {
    %c0_i32 = arith.constant 0 : i32
    %c0_i32_0 = arith.constant 0 : i32
    %c0_i32_1 = arith.constant 0 : i32
    return %c0_i32, %c0_i32_0 : i32, i32
  }
  func.func @transform_6(%arg0: i32) -> (i32, i32) {
    %c0_i32 = arith.constant 0 : i32
    %c0_i32_0 = arith.constant 0 : i32
    return %c0_i32, %arg0 : i32, i32
  }
  func.func @transform_7(%arg0: i32) -> (i32, i32) {
    %c0_i32 = arith.constant 0 : i32
    %c0_i32_0 = arith.constant 0 : i32
    %c0_i32_1 = arith.constant 0 : i32
    return %c0_i32, %c0_i32_0 : i32, i32
  }
  func.func @transform_8(%arg0: i32) -> (i32, i32) {
    %c0_i32 = arith.constant 0 : i32
    %c0_i32_0 = arith.constant 0 : i32
    %c0_i32_1 = arith.constant 0 : i32
    return %c0_i32, %c0_i32_0 : i32, i32
  }
}

</mosaic_0001>

<bundles_post_ra>
// kernel: z1_encoder_forward.4
= control target key start
LH: loop header
LB: loop body
LE: loop exit
PB: predicated region body
PF: predicated region fallthrough
CT: control target
= control target key end

     0   :  { %vm46_vm0 = vcmask 1041408   ;;  %vm33_vm1 = vcmask 80896   ;;  %v83_v6 = vlaneseq  ;;  %vm18_vm2 = vcmask 7168   ;;  %s310_s0 = inlined_call_operand.vmem [shape: f32[10,128], index: 0, kind: input, shape index: {}]   ;;  %s311_s1 = inlined_call_operand.vmem [shape: f32[32,10], index: 1, kind: input, shape index: {}]   ;;  %s312_s3 = inlined_call_operand.vmem [shape: f32[32,1], index: 3, kind: output, shape index: {1}]   ;;  %s313_s4 = inlined_call_operand.vmem [shape: f32[32,1], index: 4, kind: output, shape index: {2}]   ;;  %s314_s2 = inlined_call_operand.vmem [shape: f32[32,128], index: 2, kind: output, shape index: {0}]  }
   0x1   :  { %v32_v0 = vld [vmem:[%s310_s0 + $0x8] sm:$0x3]  ;;  %v31_v1 = vld [vmem:[%s310_s0] sm:$0xff]  ;;  %v29_v3 = vld [vmem:[%s311_s1 + $0x10] sm:$0xff]  ;;  %v162_v7 = vmov 0.0  }
   0x2   :  { %150 = vmatpush.msk.msra.mxu0 %vm46_vm0, %v32_v0  ;;  %156 = vmatpush.msk.msra.mxu2 %vm46_vm0, %v32_v0  ;;  %v27_v2 = vld [vmem:[%s311_s1] sm:$0xff]  ;;  %v28_v4 = vld [vmem:[%s311_s1 + $0x8] sm:$0xff]  ;;  %v30_v5 = vld [vmem:[%s311_s1 + $0x18] sm:$0xff]  ;;  %19 = vst.msk [vmem:[%s312_s3] sm:$0xff] %vm18_vm2, %v162_v7  ;;  %v84_v8 = vand.u32 127, %v83_v6 }
   0x3   :  { %155 = vmatpush.msk.msra.mxu1 %vm46_vm0, %v32_v0  ;;  %157 = vmatpush.msk.msra.mxu3 %vm46_vm0, %v32_v0  ;;  %20 = vst.msk [vmem:[%s312_s3 + $0x8] sm:$0xff] %vm18_vm2, %v162_v7 }
   0x4   :  { %65 = vmatpush.msra.mxu0 %v31_v1  ;;  %159 = vmatpush.msra.mxu2 %v31_v1  ;;  %21 = vst.msk [vmem:[%s312_s3 + $0x10] sm:$0xff] %vm18_vm2, %v162_v7  ;;  %vm88_vm3 = vcmp.lt.s32.totalorder %v84_v8, 16 }
   0x5   :  { %151 = vmatmul.msk.f32.vlgmr.msra.gmra.mxu0 %vm33_vm1, %v27_v2  ;;  %153 = vmatmul.msk.f32.vlgmr.msra.gmra.mxu2 %vm33_vm1, %v29_v3  ;;  %22 = vst.msk [vmem:[%s312_s3 + $0x18] sm:$0xff] %vm18_vm2, %v162_v7 }
   0x6   :  { %158 = vmatpush.msra.mxu1 %v31_v1  ;;  %160 = vmatpush.msra.mxu3 %v31_v1  ;;  %23 = vst.msk [vmem:[%s313_s4] sm:$0xff] %vm18_vm2, %v162_v7 }
   0x7   :  { %152 = vmatmul.msk.f32.vlgmr.msra.gmra.mxu1 %vm33_vm1, %v28_v4  ;;  %154 = vmatmul.msk.f32.vlgmr.msra.gmra.mxu3 %vm33_vm1, %v30_v5  ;;  %24 = vst.msk [vmem:[%s313_s4 + $0x8] sm:$0xff] %vm18_vm2, %v162_v7 }
   0x8   :  { %25 = vst.msk [vmem:[%s313_s4 + $0x10] sm:$0xff] %vm18_vm2, %v162_v7 }
   0x9   :  { %26 = vst.msk [vmem:[%s313_s4 + $0x18] sm:$0xff] %vm18_vm2, %v162_v7  ;;  %v93_v21 = vld [vmem:[%s312_s3] sm:$0xff] }
   0xa   :  { %v94_v29 = vld [vmem:[%s312_s3 + $0x8] sm:$0xff] }
   0xb   :  { %v95_v27 = vld [vmem:[%s312_s3 + $0x10] sm:$0xff] }
   0xc   :  { %v96_v36 = vld [vmem:[%s312_s3 + $0x18] sm:$0xff] }
   0xd   :  { %v114_v23 = vld [vmem:[%s313_s4] sm:$0xff] }
   0xe   :  { %v115_v32 = vld [vmem:[%s313_s4 + $0x8] sm:$0xff] }
   0xf   :  { %v116_v38 = vld [vmem:[%s313_s4 + $0x10] sm:$0xff] }
  0x10   :  { %v117_v42 = vld [vmem:[%s313_s4 + $0x18] sm:$0xff] }
  0x82   :  { %v67_v9 = vpop.f32.mrf.mxu0 }
  0x83   :  { %79 = vst [vmem:[%s314_s2] sm:$0xff] %v67_v9  ;;  %v89_v10 = vsel %vm88_vm3, %v67_v9, 0.0 }
  0x84   :  { %97 = vadd.xlane.f32.xlu0 %v89_v10  ;;  %v70_v11 = vpop.f32.mrf.mxu1  ;;  %v118_v12 = vmul.f32 %v89_v10, %v89_v10 }
  0x85   :  { %80 = vst [vmem:[%s314_s2 + $0x8] sm:$0xff] %v70_v11  ;;  %v90_v15 = vsel %vm88_vm3, %v70_v11, 0.0 }
  0x86   :  { %122 = vadd.xlane.f32.xlu2 %v118_v12  ;;  %v119_v17 = vmul.f32 %v90_v15, %v90_v15 }
  0x88   :  { %v73_v13 = vpop.f32.mrf.mxu2 }
  0x89   :  { %81 = vst [vmem:[%s314_s2 + $0x10] sm:$0xff] %v73_v13  ;;  %v91_v14 = vsel %vm88_vm3, %v73_v13, 0.0 }
  0x8a   :  { %101 = vadd.xlane.f32.xlu1 %v91_v14  ;;  %v76_v16 = vpop.f32.mrf.mxu3  ;;  %v120_v19 = vmul.f32 %v91_v14, %v91_v14 }
  0x8b   :  { %82 = vst [vmem:[%s314_s2 + $0x18] sm:$0xff] %v76_v16  ;;  %v92_v18 = vsel %vm88_vm3, %v76_v16, 0.0 }
  0x8c   :  { %99 = vadd.xlane.f32.xlu0 %v90_v15  ;;  %v121_v20 = vmul.f32 %v92_v18, %v92_v18 }
  0x8e   :  { %124 = vadd.xlane.f32.xlu2 %v119_v17 }
  0x92   :  { %103 = vadd.xlane.f32.xlu1 %v92_v18 }
  0x94   :  { %126 = vadd.xlane.f32.xlu0 %v120_v19 }
  0x9a   :  { %128 = vadd.xlane.f32.xlu1 %v121_v20 }
  0xf7   :  { %v98_v22 = vpop.xlane.xlu0 %97 }
  0xf8   :  { %v105_v24 = vadd.f32 %v98_v22, %v93_v21 }
  0xf9   :  { %v123_v25 = vpop.xlane.xlu2 %122 }
  0xfa   :  { %110 = vst.msk [vmem:[%s312_s3] sm:$0xff] %vm18_vm2, %v105_v24  ;;  %v130_v26 = vadd.f32 %v123_v25, %v114_v23 }
  0xfc   :  { %134 = vst.msk [vmem:[%s313_s4] sm:$0xff] %vm18_vm2, %v130_v26 }
  0xfd   :  { %v102_v28 = vpop.xlane.xlu1 %101 }
  0xfe   :  { %v107_v30 = vadd.f32 %v102_v28, %v95_v27 }
  0xff   :  { %v100_v31 = vpop.xlane.xlu0 %99 }
 0x100   :  { %112 = vst.msk [vmem:[%s312_s3 + $0x10] sm:$0xff] %vm18_vm2, %v107_v30  ;;  %v106_v33 = vadd.f32 %v100_v31, %v94_v29 }
 0x101   :  { %v125_v34 = vpop.xlane.xlu2 %124 }
 0x102   :  { %111 = vst.msk [vmem:[%s312_s3 + $0x8] sm:$0xff] %vm18_vm2, %v106_v33  ;;  %v131_v35 = vadd.f32 %v125_v34, %v115_v32 }
 0x104   :  { %135 = vst.msk [vmem:[%s313_s4 + $0x8] sm:$0xff] %vm18_vm2, %v131_v35 }
 0x105   :  { %v104_v37 = vpop.xlane.xlu1 %103 }
 0x106   :  { %v108_v39 = vadd.f32 %v104_v37, %v96_v36 }
 0x107   :  { %v127_v40 = vpop.xlane.xlu0 %126 }
 0x108   :  { %113 = vst.msk [vmem:[%s312_s3 + $0x18] sm:$0xff] %vm18_vm2, %v108_v39  ;;  %v132_v41 = vadd.f32 %v127_v40, %v116_v38 }
 0x10a   :  { %136 = vst.msk [vmem:[%s313_s4 + $0x10] sm:$0xff] %vm18_vm2, %v132_v41 }
 0x10d   :  { %v129_v43 = vpop.xlane.xlu1 %128 }
 0x10e   :  { %v133_v44 = vadd.f32 %v129_v43, %v117_v42 }
 0x110   :  { %137 = vst.msk [vmem:[%s313_s4 + $0x18] sm:$0xff] %vm18_vm2, %v133_v44 }

// kernel: z1_encoder_forward.7
= control target key start
LH: loop header
LB: loop body
LE: loop exit
PB: predicated region body
PF: predicated region fallthrough
CT: control target
= control target key end

     0   :  { %v127_v0 = vmov 0   ;;  %s194_s1 = inlined_call_operand.vmem [shape: f32[16,1], index: 1, kind: input, shape index: {}]   ;;  %s195_s2 = inlined_call_operand.vmem [shape: f32[16,1], index: 2, kind: input, shape index: {}]   ;;  %s196_s3 = inlined_call_operand.vmem [shape: f32[16,1], index: 3, kind: input, shape index: {}]   ;;  %s197_s4 = inlined_call_operand.vmem [shape: f32[16,1], index: 4, kind: input, shape index: {}]   ;;  %s198_s0 = inlined_call_operand.vmem [shape: f32[16,128], index: 0, kind: input, shape index: {}]   ;;  %s199_s5 = inlined_call_operand.vmem [shape: f32[16,128], index: 5, kind: output, shape index: {}]  }
   0x1   :  { %117 = vset.pattern.permute.xlu0 %v127_v0  ;;  %v23_v1 = vld [vmem:[%s194_s1 + $0x8] sm:$0xff]  ;;  %118 = vset.pattern.permute.xlu1 %v127_v0  ;;  %v22_v5 = vld [vmem:[%s194_s1] sm:$0xff] }
   0x2   :  { %v25_v2 = vld [vmem:[%s195_s2 + $0x8] sm:$0xff]  ;;  %v31_v3 = vmul.f32 0.0625, %v23_v1  ;;  %v24_v6 = vld [vmem:[%s195_s2] sm:$0xff]  ;;  %v30_v7 = vmul.f32 0.0625, %v22_v5 }
   0x3   :  { %v33_v4 = vmul.f32 0.0625, %v25_v2  ;;  %v32_v8 = vmul.f32 0.0625, %v24_v6  ;;  %v27_v27 = vld [vmem:[%s196_s3 + $0x8] sm:$0xff]  ;;  %v26_v29 = vld [vmem:[%s196_s3] sm:$0xff] }
   0x4   :  { %v35_v9 = vmul.f32 %v31_v3, %v31_v3  ;;  %v34_v10 = vmul.f32 %v30_v7, %v30_v7  ;;  %v29_v36 = vld [vmem:[%s197_s4 + $0x8] sm:$0xff]  ;;  %v28_v38 = vld [vmem:[%s197_s4] sm:$0xff] }
   0x5   :  { %v20_v43 = vld [vmem:[%s198_s0] sm:$0xff]  ;;  %v21_v44 = vld [vmem:[%s198_s0 + $0x8] sm:$0xff] }
   0x6   :  { %v37_v11 = vsub.f32 %v33_v4, %v35_v9  ;;  %v36_v12 = vsub.f32 %v32_v8, %v34_v10 }
   0x8   :  { %v39_v13 = vmax.f32 %v37_v11, 0.0  ;;  %v38_v14 = vmax.f32 %v36_v12, 0.0 }
   0xa   :  { %v41_v15 = vadd.f32 1e-05, %v39_v13  ;;  %v40_v16 = vadd.f32 1e-05, %v38_v14 }
   0xc   :  { %119 = vrsqrt.f32 %v41_v15  ;;  %vm58_vm0 = vweird.f32 %v41_v15  ;;  %vm48_vm2 = vweird.f32 %v40_v16 }
   0xd   :  { %121 = vrsqrt.f32 %v40_v16 }
  0x12   :  { %v120_v17 = vpop.eup %119 }
  0x13   :  { %v122_v18 = vpop.eup %121  ;;  %v53_v19 = vmul.f32 %v120_v17, %v41_v15  ;;  %vm59_vm1 = vweird.f32 %v120_v17 }
  0x14   :  { %v43_v20 = vmul.f32 %v122_v18, %v40_v16  ;;  %vm49_vm3 = vweird.f32 %v122_v18  ;;  %vm60_vm4 = vmor %vm58_vm0, %vm59_vm1 }
  0x15   :  { %v54_v21 = vmul.f32 %v120_v17, %v53_v19  ;;  %vm50_vm5 = vmor %vm48_vm2, %vm49_vm3 }
  0x16   :  { %v44_v22 = vmul.f32 %v122_v18, %v43_v20 }
  0x17   :  { %v55_v23 = vmul.f32 0.5, %v54_v21 }
  0x18   :  { %v45_v24 = vmul.f32 0.5, %v44_v22 }
  0x19   :  { %v56_v25 = vsub.f32 1.5, %v55_v23 }
  0x1a   :  { %v46_v26 = vsub.f32 1.5, %v45_v24 }
  0x1b   :  { %v57_v28 = vmul.f32 %v120_v17, %v56_v25 }
  0x1c   :  { %v47_v30 = vmul.f32 %v122_v18, %v46_v26 }
  0x1d   :  { %v61_v31 = vsel %vm60_vm4, %v120_v17, %v57_v28 }
  0x1e   :  { %v63_v32 = vmul.f32 %v61_v31, %v27_v27  ;;  %v51_v33 = vsel %vm50_vm5, %v122_v18, %v47_v30 }
  0x1f   :  { %v62_v34 = vmul.f32 %v51_v33, %v26_v29 }
  0x20   :  { %75 = vperm.xlu0 %117, %v63_v32   ;;  %v65_v35 = vmul.f32 %v63_v32, %v31_v3 }
  0x21   :  { %70 = vperm.xlu1 %118, %v62_v34   ;;  %v64_v37 = vmul.f32 %v62_v34, %v30_v7 }
  0x22   :  { %v67_v39 = vsub.f32 %v29_v36, %v65_v35 }
  0x23   :  { %v66_v40 = vsub.f32 %v28_v38, %v64_v37 }
  0x28   :  { %87 = vperm.xlu0 %117, %v67_v39  }
  0x29   :  { %82 = vperm.xlu1 %118, %v66_v40  }
  0x92   :  { %v76_v41 = vpop.permute.xlu0 %75 }
  0x93   :  { %v71_v42 = vpop.permute.xlu1 %70  ;;  %v79_v46 = vmul.f32 %v76_v41, %v21_v44 }
  0x94   :  { %v78_v45 = vmul.f32 %v71_v42, %v20_v43 }
  0x9a   :  { %v88_v47 = vpop.permute.xlu0 %87 }
  0x9b   :  { %v91_v48 = vadd.f32 %v88_v47, %v79_v46  ;;  %v83_v49 = vpop.permute.xlu1 %82 }
  0x9c   :  { %v90_v50 = vadd.f32 %v83_v49, %v78_v45 }
  0x9d   :  { %v96_v51 = vand.u32 2147483647, %v91_v48  ;;  %v93_v62 = vmax.f32 %v91_v48, 0.0  ;;  %vm94_vm7 = vcmp.ne.f32.partialorder %v91_v48, %v91_v48 }
  0x9e   :  { %92 = vst [vmem:[%s199_s5] sm:$0xff] %v90_v50 }
  0x9f   :  { %v97_v52 = vsub.f32 0.0, %v96_v51 }
  0xa1   :  { %v98_v53 = vmul.f32 1.442695, %v97_v52 }
  0xa3   :  { %123 = vpow2.f32 %v98_v53 }
  0xa9   :  { %v124_v54 = vpop.eup %123 }
  0xaa   :  { %v100_v55 = vadd.f32 1.0, %v124_v54  ;;  %v103_v56 = vmul.f32 -0.5, %v124_v54  ;;  %v106_v58 = vand.u32 2147483647, %v124_v54 }
  0xac   :  { %125 = vlog2.f32 %v100_v55  ;;  %v104_v57 = vadd.f32 1.0, %v103_v56  ;;  %vm107_vm6 = vcmp.lt.f32.partialorder %v106_v58, 0.0004427343 }
  0xae   :  { %v105_v61 = vmul.f32 %v124_v54, %v104_v57 }
  0xb2   :  { %v126_v59 = vpop.eup %125 }
  0xb3   :  { %v102_v60 = vmul.f32 0.6931472, %v126_v59 }
  0xb5   :  { %v108_v63 = vsel %vm107_vm6, %v105_v61, %v102_v60 }
  0xb6   :  { %v109_v0 = vadd.f32 %v108_v63, %v93_v62 }
  0xb8   :  { %v110_v1 = vsel %vm94_vm7, %v91_v48, %v109_v0 }
  0xb9   :  { %111 = vst [vmem:[%s199_s5 + $0x8] sm:$0xff] %v110_v1 }

// kernel: z1_encoder_forward.5
= control target key start
LH: loop header
LB: loop body
LE: loop exit
PB: predicated region body
PF: predicated region fallthrough
CT: control target
= control target key end

     0   :  { %v333_v0 = vmov 0   ;;  %vm191_vm12 = vcmask 261120   ;;  %vm30_vm13 = vcmask 7168   ;;  %s582_s1 = inlined_call_operand.vmem [shape: f32[32,1], index: 1, kind: input, shape index: {}]   ;;  %s583_s2 = inlined_call_operand.vmem [shape: f32[32,1], index: 2, kind: input, shape index: {}]   ;;  %s584_s3 = inlined_call_operand.vmem [shape: f32[32,1], index: 3, kind: input, shape index: {}]   ;;  %s585_s4 = inlined_call_operand.vmem [shape: f32[32,1], index: 4, kind: input, shape index: {}]   ;;  %s586_s0 = inlined_call_operand.vmem [shape: f32[32,128], index: 0, kind: input, shape index: {}]   ;;  %s587_s5 = inlined_call_operand.vmem [shape: f32[32,32], index: 5, kind: input, shape index: {}]   ;;  %s588_s7 = inlined_call_operand.vmem [shape: f32[32,1], index: 7, kind: output, shape index: {1}]   ;;  %s589_s8 = inlined_call_operand.vmem [shape: f32[32,1], index: 8, kind: output, shape index: {2}]   ;;  %s590_s6 = inlined_call_operand.vmem [shape: f32[32,128], index: 6, kind: output, shape index: {0}]  }
   0x1   :  { %323 = vset.pattern.permute.xlu1 %v333_v0  ;;  %322 = vset.pattern.permute.xlu0 %v333_v0  ;;  %v46_v1 = vld [vmem:[%s582_s1 + $0x18] sm:$0xff]  ;;  %v45_v5 = vld [vmem:[%s582_s1 + $0x10] sm:$0xff]  ;;  %v44_v6 = vld [vmem:[%s582_s1 + $0x8] sm:$0xff] }
   0x2   :  { %v50_v2 = vld [vmem:[%s583_s2 + $0x18] sm:$0xff]  ;;  %v386_v3 = vmul.f32 0.0625, %v46_v1  ;;  %v48_v7 = vld [vmem:[%s583_s2 + $0x8] sm:$0xff]  ;;  %324 = vset.pattern.permute.xlu2 %v333_v0  ;;  %v397_v8 = vmul.f32 0.0625, %v45_v5  ;;  %v399_v9 = vmul.f32 0.0625, %v44_v6  ;;  %v49_v11 = vld [vmem:[%s583_s2 + $0x10] sm:$0xff] }
   0x3   :  { %v66_v4 = vmul.f32 0.0625, %v50_v2  ;;  %v64_v10 = vmul.f32 0.0625, %v48_v7  ;;  %v65_v13 = vmul.f32 0.0625, %v49_v11  ;;  %v43_v14 = vld [vmem:[%s582_s1] sm:$0xff]  ;;  %v54_v52 = vld [vmem:[%s584_s3 + $0x18] sm:$0xff]  ;;  %v52_v55 = vld [vmem:[%s584_s3 + $0x8] sm:$0xff] }
   0x4   :  { %v70_v12 = vmul.f32 %v386_v3, %v386_v3  ;;  %v47_v15 = vld [vmem:[%s583_s2] sm:$0xff]  ;;  %v68_v16 = vmul.f32 %v399_v9, %v399_v9  ;;  %v69_v17 = vmul.f32 %v397_v8, %v397_v8  ;;  %v416_v18 = vmul.f32 0.0625, %v43_v14  ;;  %v53_v59 = vld [vmem:[%s584_s3 + $0x10] sm:$0xff]  ;;  %v58_v6 = vld [vmem:[%s585_s4 + $0x18] sm:$0xff] }
   0x5   :  { %v63_v19 = vmul.f32 0.0625, %v47_v15  ;;  %v57_v5 = vld [vmem:[%s585_s4 + $0x10] sm:$0xff]  ;;  %v51_v7 = vld [vmem:[%s584_s3] sm:$0xff]  ;;  %v56_v15 = vld [vmem:[%s585_s4 + $0x8] sm:$0xff] }
   0x6   :  { %v74_v20 = vsub.f32 %v66_v4, %v70_v12  ;;  %v72_v21 = vsub.f32 %v64_v10, %v68_v16  ;;  %v73_v22 = vsub.f32 %v65_v13, %v69_v17  ;;  %v67_v23 = vmul.f32 %v416_v18, %v416_v18  ;;  %v55_v17 = vld [vmem:[%s585_s4] sm:$0xff] }
   0x8   :  { %v78_v24 = vmax.f32 %v74_v20, 0.0  ;;  %v76_v25 = vmax.f32 %v72_v21, 0.0  ;;  %v77_v26 = vmax.f32 %v73_v22, 0.0  ;;  %v71_v27 = vsub.f32 %v63_v19, %v67_v23  ;;  %v42_v22 = vld [vmem:[%s586_s0 + $0x18] sm:$0xff] }
   0xa   :  { %v82_v28 = vadd.f32 1e-05, %v78_v24  ;;  %v80_v29 = vadd.f32 1e-05, %v76_v25  ;;  %v81_v30 = vadd.f32 1e-05, %v77_v26 }
   0xb   :  { %v75_v31 = vmax.f32 %v71_v27, 0.0 }
   0xc   :  { %325 = vrsqrt.f32 %v82_v28  ;;  %vm119_vm0 = vweird.f32 %v82_v28  ;;  %vm99_vm2 = vweird.f32 %v80_v29  ;;  %vm109_vm4 = vweird.f32 %v81_v30 }
   0xd   :  { %327 = vrsqrt.f32 %v80_v29  ;;  %v79_v32 = vadd.f32 1e-05, %v75_v31 }
   0xe   :  { %329 = vrsqrt.f32 %v81_v30 }
   0xf   :  { %331 = vrsqrt.f32 %v79_v32  ;;  %vm89_vm9 = vweird.f32 %v79_v32 }
  0x12   :  { %v326_v33 = vpop.eup %325 }
  0x13   :  { %v328_v34 = vpop.eup %327  ;;  %v114_v35 = vmul.f32 %v326_v33, %v82_v28  ;;  %vm120_vm1 = vweird.f32 %v326_v33 }
  0x14   :  { %v330_v36 = vpop.eup %329  ;;  %v94_v37 = vmul.f32 %v328_v34, %v80_v29  ;;  %vm100_vm3 = vweird.f32 %v328_v34  ;;  %vm420_vm6 = vmor %vm119_vm0, %vm120_vm1  ;;  %v40_v29 = vld [vmem:[%s586_s0 + $0x8] sm:$0xff] }
  0x15   :  { %v332_v38 = vpop.eup %331  ;;  %v115_v39 = vmul.f32 %v326_v33, %v114_v35  ;;  %v104_v40 = vmul.f32 %v330_v36, %v81_v30  ;;  %vm110_vm5 = vweird.f32 %v330_v36  ;;  %vm101_vm7 = vmor %vm99_vm2, %vm100_vm3 }
  0x16   :  { %v95_v41 = vmul.f32 %v328_v34, %v94_v37  ;;  %v84_v42 = vmul.f32 %v332_v38, %v79_v32  ;;  %vm111_vm8 = vmor %vm109_vm4, %vm110_vm5  ;;  %vm90_vm10 = vweird.f32 %v332_v38 }
  0x17   :  { %v116_v43 = vmul.f32 0.5, %v115_v39  ;;  %v105_v44 = vmul.f32 %v330_v36, %v104_v40  ;;  %vm91_vm11 = vmor %vm89_vm9, %vm90_vm10 }
  0x18   :  { %v96_v45 = vmul.f32 0.5, %v95_v41  ;;  %v85_v46 = vmul.f32 %v332_v38, %v84_v42  ;;  %v187_v42 = vld [vmem:[%s587_s5] sm:$0xff] }
  0x19   :  { %v117_v47 = vsub.f32 1.5, %v116_v43  ;;  %v106_v48 = vmul.f32 0.5, %v105_v44  ;;  %v189_v43 = vld [vmem:[%s587_s5 + $0x10] sm:$0xff]  ;;  %v188_v44 = vld [vmem:[%s587_s5 + $0x8] sm:$0xff] }
  0x1a   :  { %v97_v50 = vsub.f32 1.5, %v96_v45  ;;  %v86_v51 = vmul.f32 0.5, %v85_v46  ;;  %v190_v45 = vld [vmem:[%s587_s5 + $0x18] sm:$0xff]  ;;  %v237_v46 = vlaneseq }
  0x1b   :  { %v118_v53 = vmul.f32 %v326_v33, %v117_v47  ;;  %v107_v54 = vsub.f32 1.5, %v106_v48  ;;  %v334_v48 = vmov 0.0  }
  0x1c   :  { %v98_v56 = vmul.f32 %v328_v34, %v97_v50  ;;  %v87_v57 = vsub.f32 1.5, %v86_v51  ;;  %v238_v47 = vand.u32 127, %v237_v46  ;;  %31 = vst.msk [vmem:[%s588_s7] sm:$0xff] %vm30_vm13, %v334_v48 }
  0x1d   :  { %v122_v58 = vsel %vm420_vm6, %v326_v33, %v118_v53  ;;  %v108_v60 = vmul.f32 %v330_v36, %v107_v54  ;;  %v39_v33 = vld [vmem:[%s586_s0] sm:$0xff]  ;;  %32 = vst.msk [vmem:[%s588_s7 + $0x8] sm:$0xff] %vm30_vm13, %v334_v48 }
  0x1e   :  { %v126_v61 = vmul.f32 %v122_v58, %v54_v52  ;;  %v102_v62 = vsel %vm101_vm7, %v328_v34, %v98_v56  ;;  %v88_v63 = vmul.f32 %v332_v38, %v87_v57  ;;  %33 = vst.msk [vmem:[%s588_s7 + $0x10] sm:$0xff] %vm30_vm13, %v334_v48  ;;  %vm242_vm14 = vcmp.lt.s32.totalorder %v238_v47, 16 }
  0x1f   :  { %v124_v0 = vmul.f32 %v102_v62, %v52_v55  ;;  %v112_v1 = vsel %vm111_vm8, %v330_v36, %v108_v60  ;;  %34 = vst.msk [vmem:[%s588_s7 + $0x18] sm:$0xff] %vm30_vm13, %v334_v48 }
  0x20   :  { %152 = vperm.xlu0 %322, %v126_v61   ;;  %v125_v2 = vmul.f32 %v112_v1, %v53_v59  ;;  %v130_v4 = vmul.f32 %v126_v61, %v386_v3  ;;  %v92_v10 = vsel %vm91_vm11, %v332_v38, %v88_v63  ;;  %35 = vst.msk [vmem:[%s589_s8] sm:$0xff] %vm30_vm13, %v334_v48 }
  0x21   :  { %142 = vperm.xlu1 %323, %v124_v0   ;;  %v123_v14 = vmul.f32 %v92_v10, %v51_v7  ;;  %v128_v3 = vmul.f32 %v124_v0, %v399_v9  ;;  %36 = vst.msk [vmem:[%s589_s8 + $0x8] sm:$0xff] %vm30_vm13, %v334_v48 }
  0x22   :  { %v129_v11 = vmul.f32 %v125_v2, %v397_v8  ;;  %v134_v13 = vsub.f32 %v58_v6, %v130_v4  ;;  %37 = vst.msk [vmem:[%s589_s8 + $0x10] sm:$0xff] %vm30_vm13, %v334_v48 }
  0x23   :  { %v127_v16 = vmul.f32 %v123_v14, %v416_v18  ;;  %v132_v19 = vsub.f32 %v56_v15, %v128_v3  ;;  %v41_v18 = vld [vmem:[%s586_s0 + $0x10] sm:$0xff]  ;;  %38 = vst.msk [vmem:[%s589_s8 + $0x18] sm:$0xff] %vm30_vm13, %v334_v48  ;;  %v247_v61 = vld [vmem:[%s588_s7] sm:$0xff] }
  0x24   :  { %v133_v12 = vsub.f32 %v57_v5, %v129_v11  ;;  %v248_v62 = vld [vmem:[%s588_s7 + $0x8] sm:$0xff] }
  0x25   :  { %v131_v8 = vsub.f32 %v55_v17, %v127_v16  ;;  %v249_v4 = vld [vmem:[%s588_s7 + $0x10] sm:$0xff] }
  0x26   :  { %171 = vperm.xlu2 %324, %v133_v12   ;;  %v250_v15 = vld [vmem:[%s588_s7 + $0x18] sm:$0xff] }
  0x27   :  { %v268_v5 = vld [vmem:[%s589_s8] sm:$0xff] }
  0x28   :  { %147 = vperm.xlu0 %322, %v125_v2   ;;  %v269_v10 = vld [vmem:[%s589_s8 + $0x8] sm:$0xff] }
  0x29   :  { %176 = vperm.xlu1 %323, %v134_v13   ;;  %v270_v3 = vld [vmem:[%s589_s8 + $0x10] sm:$0xff] }
  0x2e   :  { %137 = vperm.xlu2 %324, %v123_v14  }
  0x30   :  { %166 = vperm.xlu0 %322, %v132_v19  }
  0x31   :  { %161 = vperm.xlu1 %323, %v131_v8  }
  0x80   :  { %v172_v9 = vpop.permute.xlu2 %171 }
  0x88   :  { %v138_v32 = vpop.permute.xlu2 %137 }
  0x89   :  { %v155_v35 = vmul.f32 %v138_v32, %v39_v33 }
  0x92   :  { %v153_v20 = vpop.permute.xlu0 %152 }
  0x93   :  { %v143_v21 = vpop.permute.xlu1 %142  ;;  %v158_v23 = vmul.f32 %v153_v20, %v42_v22  ;;  %v271_v20 = vld [vmem:[%s589_s8 + $0x18] sm:$0xff] }
  0x94   :  { %v156_v34 = vmul.f32 %v143_v21, %v40_v29 }
  0x9a   :  { %v148_v24 = vpop.permute.xlu0 %147 }
  0x9b   :  { %v157_v25 = vmul.f32 %v148_v24, %v41_v18  ;;  %v177_v26 = vpop.permute.xlu1 %176 }
  0x9c   :  { %v182_v27 = vadd.f32 %v177_v26, %v158_v23 }
  0x9d   :  { %v181_v28 = vadd.f32 %v172_v9, %v157_v25 }
  0x9e   :  { %v186_v30 = vmax.f32 %v182_v27, 0.0 }
  0x9f   :  { %v185_v31 = vmax.f32 %v181_v28, 0.0 }
  0xa0   :  { %216 = vmatpush.msra.mxu0 %v186_v30  ;;  %308 = vmatpush.msra.mxu1 %v186_v30 }
  0xa1   :  { %309 = vmatpush.msra.mxu2 %v186_v30  ;;  %310 = vmatpush.msra.mxu3 %v186_v30 }
  0xa2   :  { %217 = vmatpush.msra.mxu0 %v185_v31  ;;  %311 = vmatpush.msra.mxu1 %v185_v31  ;;  %v167_v36 = vpop.permute.xlu0 %166 }
  0xa3   :  { %312 = vmatpush.msra.mxu2 %v185_v31  ;;  %313 = vmatpush.msra.mxu3 %v185_v31  ;;  %v180_v37 = vadd.f32 %v167_v36, %v156_v34  ;;  %v162_v38 = vpop.permute.xlu1 %161 }
  0xa4   :  { %v179_v39 = vadd.f32 %v162_v38, %v155_v35 }
  0xa5   :  { %v184_v40 = vmax.f32 %v180_v37, 0.0 }
  0xa6   :  { %v183_v41 = vmax.f32 %v179_v39, 0.0 }
  0xa7   :  { %218 = vmatpush.msra.mxu0 %v184_v40  ;;  %314 = vmatpush.msra.mxu1 %v184_v40 }
  0xa8   :  { %315 = vmatpush.msra.mxu2 %v184_v40  ;;  %316 = vmatpush.msra.mxu3 %v184_v40 }
  0xa9   :  { %219 = vmatpush.msra.mxu0 %v183_v41  ;;  %317 = vmatpush.msra.mxu1 %v183_v41 }
  0xaa   :  { %318 = vmatpush.msra.mxu2 %v183_v41  ;;  %319 = vmatpush.msra.mxu3 %v183_v41 }
  0xab   :  { %304 = vmatmul.msk.f32.vlgmr.msra.gmra.mxu0 %vm191_vm12, %v187_v42  ;;  %306 = vmatmul.msk.f32.vlgmr.msra.gmra.mxu2 %vm191_vm12, %v189_v43 }
  0xac   :  { %305 = vmatmul.msk.f32.vlgmr.msra.gmra.mxu1 %vm191_vm12, %v188_v44  ;;  %307 = vmatmul.msk.f32.vlgmr.msra.gmra.mxu3 %vm191_vm12, %v190_v45 }
 0x128   :  { %v221_v49 = vpop.f32.mrf.mxu0 }
 0x129   :  { %233 = vst [vmem:[%s590_s6] sm:$0xff] %v221_v49  ;;  %v243_v50 = vsel %vm242_vm14, %v221_v49, 0.0  ;;  %v224_v51 = vpop.f32.mrf.mxu1 }
 0x12a   :  { %251 = vadd.xlane.f32.xlu2 %v243_v50  ;;  %234 = vst [vmem:[%s590_s6 + $0x8] sm:$0xff] %v224_v51  ;;  %v244_v52 = vsel %vm242_vm14, %v224_v51, 0.0  ;;  %v272_v57 = vmul.f32 %v243_v50, %v243_v50 }
 0x12b   :  { %253 = vadd.xlane.f32.xlu0 %v244_v52  ;;  %v273_v56 = vmul.f32 %v244_v52, %v244_v52 }
 0x12e   :  { %v227_v53 = vpop.f32.mrf.mxu2 }
 0x12f   :  { %235 = vst [vmem:[%s590_s6 + $0x10] sm:$0xff] %v227_v53  ;;  %v245_v54 = vsel %vm242_vm14, %v227_v53, 0.0  ;;  %v230_v55 = vpop.f32.mrf.mxu3 }
 0x130   :  { %255 = vadd.xlane.f32.xlu1 %v245_v54  ;;  %236 = vst [vmem:[%s590_s6 + $0x18] sm:$0xff] %v230_v55  ;;  %v274_v58 = vmul.f32 %v245_v54, %v245_v54  ;;  %v246_v59 = vsel %vm242_vm14, %v230_v55, 0.0 }
 0x131   :  { %v275_v60 = vmul.f32 %v246_v59, %v246_v59 }
 0x132   :  { %276 = vadd.xlane.f32.xlu2 %v272_v57 }
 0x133   :  { %278 = vadd.xlane.f32.xlu0 %v273_v56 }
 0x138   :  { %280 = vadd.xlane.f32.xlu1 %v274_v58 }
 0x13a   :  { %257 = vadd.xlane.f32.xlu2 %v246_v59 }
 0x142   :  { %282 = vadd.xlane.f32.xlu2 %v275_v60 }
 0x19d   :  { %v252_v63 = vpop.xlane.xlu2 %251 }
 0x19e   :  { %v259_v0 = vadd.f32 %v252_v63, %v247_v61  ;;  %v254_v1 = vpop.xlane.xlu0 %253 }
 0x19f   :  { %v260_v2 = vadd.f32 %v254_v1, %v248_v62 }
 0x1a0   :  { %264 = vst.msk [vmem:[%s588_s7] sm:$0xff] %vm30_vm13, %v259_v0 }
 0x1a1   :  { %265 = vst.msk [vmem:[%s588_s7 + $0x8] sm:$0xff] %vm30_vm13, %v260_v2 }
 0x1a3   :  { %v256_v6 = vpop.xlane.xlu1 %255 }
 0x1a4   :  { %v261_v7 = vadd.f32 %v256_v6, %v249_v4 }
 0x1a5   :  { %v277_v11 = vpop.xlane.xlu2 %276 }
 0x1a6   :  { %v284_v12 = vadd.f32 %v277_v11, %v268_v5  ;;  %266 = vst.msk [vmem:[%s588_s7 + $0x10] sm:$0xff] %vm30_vm13, %v261_v7  ;;  %v279_v13 = vpop.xlane.xlu0 %278 }
 0x1a7   :  { %v285_v14 = vadd.f32 %v279_v13, %v269_v10 }
 0x1a8   :  { %288 = vst.msk [vmem:[%s589_s8] sm:$0xff] %vm30_vm13, %v284_v12 }
 0x1a9   :  { %289 = vst.msk [vmem:[%s589_s8 + $0x8] sm:$0xff] %vm30_vm13, %v285_v14 }
 0x1ab   :  { %v281_v16 = vpop.xlane.xlu1 %280 }
 0x1ac   :  { %v286_v17 = vadd.f32 %v281_v16, %v270_v3 }
 0x1ad   :  { %v258_v19 = vpop.xlane.xlu2 %257 }
 0x1ae   :  { %v262_v8 = vadd.f32 %v258_v19, %v250_v15  ;;  %290 = vst.msk [vmem:[%s589_s8 + $0x10] sm:$0xff] %vm30_vm13, %v286_v17 }
 0x1b0   :  { %267 = vst.msk [vmem:[%s588_s7 + $0x18] sm:$0xff] %vm30_vm13, %v262_v8 }
 0x1b5   :  { %v283_v21 = vpop.xlane.xlu2 %282 }
 0x1b6   :  { %v287_v9 = vadd.f32 %v283_v21, %v271_v20 }
 0x1b8   :  { %291 = vst.msk [vmem:[%s589_s8 + $0x18] sm:$0xff] %vm30_vm13, %v287_v9 }

// kernel: z1_encoder_forward.6
= control target key start
LH: loop header
LB: loop body
LE: loop exit
PB: predicated region body
PF: predicated region fallthrough
CT: control target
= control target key end

     0   :  { %v279_v0 = vmov 0   ;;  %vm185_vm12 = vcmask 261120   ;;  %vm30_vm13 = vcmask 7168   ;;  %s468_s1 = inlined_call_operand.vmem [shape: f32[32,1], index: 1, kind: input, shape index: {}]   ;;  %s469_s2 = inlined_call_operand.vmem [shape: f32[32,1], index: 2, kind: input, shape index: {}]   ;;  %s470_s3 = inlined_call_operand.vmem [shape: f32[32,1], index: 3, kind: input, shape index: {}]   ;;  %s471_s4 = inlined_call_operand.vmem [shape: f32[32,1], index: 4, kind: input, shape index: {}]   ;;  %s472_s0 = inlined_call_operand.vmem [shape: f32[32,128], index: 0, kind: input, shape index: {}]   ;;  %s473_s5 = inlined_call_operand.vmem [shape: f32[16,32], index: 5, kind: input, shape index: {}]   ;;  %s474_s7 = inlined_call_operand.vmem [shape: f32[16,1], index: 7, kind: output, shape index: {1}]   ;;  %s475_s8 = inlined_call_operand.vmem [shape: f32[16,1], index: 8, kind: output, shape index: {2}]   ;;  %s476_s6 = inlined_call_operand.vmem [shape: f32[16,128], index: 6, kind: output, shape index: {0}]  }
   0x1   :  { %269 = vset.pattern.permute.xlu1 %v279_v0  ;;  %268 = vset.pattern.permute.xlu0 %v279_v0  ;;  %v42_v1 = vld [vmem:[%s468_s1 + $0x18] sm:$0xff]  ;;  %v41_v5 = vld [vmem:[%s468_s1 + $0x10] sm:$0xff]  ;;  %v40_v6 = vld [vmem:[%s468_s1 + $0x8] sm:$0xff] }
   0x2   :  { %v46_v2 = vld [vmem:[%s469_s2 + $0x18] sm:$0xff]  ;;  %v332_v3 = vmul.f32 0.0625, %v42_v1  ;;  %v44_v7 = vld [vmem:[%s469_s2 + $0x8] sm:$0xff]  ;;  %270 = vset.pattern.permute.xlu2 %v279_v0  ;;  %v343_v8 = vmul.f32 0.0625, %v41_v5  ;;  %v345_v9 = vmul.f32 0.0625, %v40_v6  ;;  %v45_v11 = vld [vmem:[%s469_s2 + $0x10] sm:$0xff] }
   0x3   :  { %v62_v4 = vmul.f32 0.0625, %v46_v2  ;;  %v60_v10 = vmul.f32 0.0625, %v44_v7  ;;  %v61_v13 = vmul.f32 0.0625, %v45_v11  ;;  %v39_v14 = vld [vmem:[%s468_s1] sm:$0xff]  ;;  %v50_v52 = vld [vmem:[%s470_s3 + $0x18] sm:$0xff]  ;;  %v48_v55 = vld [vmem:[%s470_s3 + $0x8] sm:$0xff] }
   0x4   :  { %v66_v12 = vmul.f32 %v332_v3, %v332_v3  ;;  %v43_v15 = vld [vmem:[%s469_s2] sm:$0xff]  ;;  %v64_v16 = vmul.f32 %v345_v9, %v345_v9  ;;  %v65_v17 = vmul.f32 %v343_v8, %v343_v8  ;;  %v362_v18 = vmul.f32 0.0625, %v39_v14  ;;  %v49_v59 = vld [vmem:[%s470_s3 + $0x10] sm:$0xff]  ;;  %v54_v6 = vld [vmem:[%s471_s4 + $0x18] sm:$0xff] }
   0x5   :  { %v59_v19 = vmul.f32 0.0625, %v43_v15  ;;  %v53_v5 = vld [vmem:[%s471_s4 + $0x10] sm:$0xff]  ;;  %v47_v7 = vld [vmem:[%s470_s3] sm:$0xff]  ;;  %v52_v15 = vld [vmem:[%s471_s4 + $0x8] sm:$0xff] }
   0x6   :  { %v70_v20 = vsub.f32 %v62_v4, %v66_v12  ;;  %v68_v21 = vsub.f32 %v60_v10, %v64_v16  ;;  %v69_v22 = vsub.f32 %v61_v13, %v65_v17  ;;  %v63_v23 = vmul.f32 %v362_v18, %v362_v18  ;;  %v51_v17 = vld [vmem:[%s471_s4] sm:$0xff] }
   0x8   :  { %v74_v24 = vmax.f32 %v70_v20, 0.0  ;;  %v72_v25 = vmax.f32 %v68_v21, 0.0  ;;  %v73_v26 = vmax.f32 %v69_v22, 0.0  ;;  %v67_v27 = vsub.f32 %v59_v19, %v63_v23  ;;  %v38_v22 = vld [vmem:[%s472_s0 + $0x18] sm:$0xff] }
   0xa   :  { %v78_v28 = vadd.f32 1e-05, %v74_v24  ;;  %v76_v29 = vadd.f32 1e-05, %v72_v25  ;;  %v77_v30 = vadd.f32 1e-05, %v73_v26 }
   0xb   :  { %v71_v31 = vmax.f32 %v67_v27, 0.0 }
   0xc   :  { %271 = vrsqrt.f32 %v78_v28  ;;  %vm115_vm0 = vweird.f32 %v78_v28  ;;  %vm95_vm2 = vweird.f32 %v76_v29  ;;  %vm105_vm4 = vweird.f32 %v77_v30 }
   0xd   :  { %273 = vrsqrt.f32 %v76_v29  ;;  %v75_v32 = vadd.f32 1e-05, %v71_v31 }
   0xe   :  { %275 = vrsqrt.f32 %v77_v30 }
   0xf   :  { %277 = vrsqrt.f32 %v75_v32  ;;  %vm85_vm9 = vweird.f32 %v75_v32 }
  0x12   :  { %v272_v33 = vpop.eup %271 }
  0x13   :  { %v274_v34 = vpop.eup %273  ;;  %v110_v35 = vmul.f32 %v272_v33, %v78_v28  ;;  %vm116_vm1 = vweird.f32 %v272_v33 }
  0x14   :  { %v276_v36 = vpop.eup %275  ;;  %v90_v37 = vmul.f32 %v274_v34, %v76_v29  ;;  %vm96_vm3 = vweird.f32 %v274_v34  ;;  %vm366_vm6 = vmor %vm115_vm0, %vm116_vm1  ;;  %v36_v29 = vld [vmem:[%s472_s0 + $0x8] sm:$0xff] }
  0x15   :  { %v278_v38 = vpop.eup %277  ;;  %v111_v39 = vmul.f32 %v272_v33, %v110_v35  ;;  %v100_v40 = vmul.f32 %v276_v36, %v77_v30  ;;  %vm106_vm5 = vweird.f32 %v276_v36  ;;  %vm97_vm7 = vmor %vm95_vm2, %vm96_vm3 }
  0x16   :  { %v91_v41 = vmul.f32 %v274_v34, %v90_v37  ;;  %v80_v42 = vmul.f32 %v278_v38, %v75_v32  ;;  %vm107_vm8 = vmor %vm105_vm4, %vm106_vm5  ;;  %vm86_vm10 = vweird.f32 %v278_v38  ;;  %v35_v32 = vld [vmem:[%s472_s0] sm:$0xff] }
  0x17   :  { %v112_v43 = vmul.f32 0.5, %v111_v39  ;;  %v101_v44 = vmul.f32 %v276_v36, %v100_v40  ;;  %vm87_vm11 = vmor %vm85_vm9, %vm86_vm10 }
  0x18   :  { %v92_v45 = vmul.f32 0.5, %v91_v41  ;;  %v81_v46 = vmul.f32 %v278_v38, %v80_v42  ;;  %v183_v42 = vld [vmem:[%s473_s5] sm:$0xff] }
  0x19   :  { %v113_v47 = vsub.f32 1.5, %v112_v43  ;;  %v102_v48 = vmul.f32 0.5, %v101_v44  ;;  %v184_v43 = vld [vmem:[%s473_s5 + $0x8] sm:$0xff]  ;;  %v280_v44 = vmov 0.0  }
  0x1a   :  { %v93_v50 = vsub.f32 1.5, %v92_v45  ;;  %v82_v51 = vmul.f32 0.5, %v81_v46  ;;  %31 = vst.msk [vmem:[%s474_s7] sm:$0xff] %vm30_vm13, %v280_v44  ;;  %v217_v45 = vlaneseq }
  0x1b   :  { %v114_v53 = vmul.f32 %v272_v33, %v113_v47  ;;  %v103_v54 = vsub.f32 1.5, %v102_v48  ;;  %32 = vst.msk [vmem:[%s474_s7 + $0x8] sm:$0xff] %vm30_vm13, %v280_v44 }
  0x1c   :  { %v94_v56 = vmul.f32 %v274_v34, %v93_v50  ;;  %v83_v57 = vsub.f32 1.5, %v82_v51  ;;  %33 = vst.msk [vmem:[%s475_s8] sm:$0xff] %vm30_vm13, %v280_v44  ;;  %v218_v46 = vand.u32 127, %v217_v45 }
  0x1d   :  { %v118_v58 = vsel %vm366_vm6, %v272_v33, %v114_v53  ;;  %v104_v60 = vmul.f32 %v276_v36, %v103_v54  ;;  %34 = vst.msk [vmem:[%s475_s8 + $0x8] sm:$0xff] %vm30_vm13, %v280_v44 }
  0x1e   :  { %v122_v61 = vmul.f32 %v118_v58, %v50_v52  ;;  %v98_v62 = vsel %vm97_vm7, %v274_v34, %v94_v56  ;;  %v84_v63 = vmul.f32 %v278_v38, %v83_v57  ;;  %vm222_vm14 = vcmp.lt.s32.totalorder %v218_v46, 16 }
  0x1f   :  { %v120_v0 = vmul.f32 %v98_v62, %v48_v55  ;;  %v108_v1 = vsel %vm107_vm8, %v276_v36, %v104_v60 }
  0x20   :  { %148 = vperm.xlu0 %268, %v122_v61   ;;  %v121_v2 = vmul.f32 %v108_v1, %v49_v59  ;;  %v126_v4 = vmul.f32 %v122_v61, %v332_v3  ;;  %v88_v10 = vsel %vm87_vm11, %v278_v38, %v84_v63 }
  0x21   :  { %138 = vperm.xlu1 %269, %v120_v0   ;;  %v119_v14 = vmul.f32 %v88_v10, %v47_v7  ;;  %v124_v3 = vmul.f32 %v120_v0, %v345_v9  ;;  %v225_v53 = vld [vmem:[%s474_s7] sm:$0xff] }
  0x22   :  { %v125_v11 = vmul.f32 %v121_v2, %v343_v8  ;;  %v130_v13 = vsub.f32 %v54_v6, %v126_v4  ;;  %v226_v54 = vld [vmem:[%s474_s7 + $0x8] sm:$0xff] }
  0x23   :  { %v123_v16 = vmul.f32 %v119_v14, %v362_v18  ;;  %v128_v19 = vsub.f32 %v52_v15, %v124_v3  ;;  %v37_v18 = vld [vmem:[%s472_s0 + $0x10] sm:$0xff]  ;;  %v236_v56 = vld [vmem:[%s475_s8] sm:$0xff] }
  0x24   :  { %v129_v12 = vsub.f32 %v53_v5, %v125_v11  ;;  %v237_v62 = vld [vmem:[%s475_s8 + $0x8] sm:$0xff] }
  0x25   :  { %v127_v8 = vsub.f32 %v51_v17, %v123_v16 }
  0x26   :  { %167 = vperm.xlu2 %270, %v129_v12  }
  0x28   :  { %143 = vperm.xlu0 %268, %v121_v2  }
  0x29   :  { %172 = vperm.xlu1 %269, %v130_v13  }
  0x2e   :  { %133 = vperm.xlu2 %270, %v119_v14  }
  0x30   :  { %162 = vperm.xlu0 %268, %v128_v19  }
  0x31   :  { %157 = vperm.xlu1 %269, %v127_v8  }
  0x80   :  { %v168_v9 = vpop.permute.xlu2 %167 }
  0x88   :  { %v134_v31 = vpop.permute.xlu2 %133 }
  0x89   :  { %v151_v35 = vmul.f32 %v134_v31, %v35_v32 }
  0x92   :  { %v149_v20 = vpop.permute.xlu0 %148 }
  0x93   :  { %v139_v21 = vpop.permute.xlu1 %138  ;;  %v154_v23 = vmul.f32 %v149_v20, %v38_v22 }
  0x94   :  { %v152_v34 = vmul.f32 %v139_v21, %v36_v29 }
  0x9a   :  { %v144_v24 = vpop.permute.xlu0 %143 }
  0x9b   :  { %v153_v25 = vmul.f32 %v144_v24, %v37_v18  ;;  %v173_v26 = vpop.permute.xlu1 %172 }
  0x9c   :  { %v178_v27 = vadd.f32 %v173_v26, %v154_v23 }
  0x9d   :  { %v177_v28 = vadd.f32 %v168_v9, %v153_v25 }
  0x9e   :  { %v182_v30 = vmax.f32 %v178_v27, 0.0 }
  0x9f   :  { %v181_v33 = vmax.f32 %v177_v28, 0.0 }
  0xa0   :  { %204 = vmatpush.msra.mxu0 %v182_v30  ;;  %262 = vmatpush.msra.mxu1 %v182_v30 }
  0xa2   :  { %205 = vmatpush.msra.mxu0 %v181_v33  ;;  %263 = vmatpush.msra.mxu1 %v181_v33  ;;  %v163_v36 = vpop.permute.xlu0 %162 }
  0xa3   :  { %v176_v37 = vadd.f32 %v163_v36, %v152_v34  ;;  %v158_v38 = vpop.permute.xlu1 %157 }
  0xa4   :  { %v175_v39 = vadd.f32 %v158_v38, %v151_v35 }
  0xa5   :  { %v180_v40 = vmax.f32 %v176_v37, 0.0 }
  0xa6   :  { %v179_v41 = vmax.f32 %v175_v39, 0.0 }
  0xa7   :  { %206 = vmatpush.msra.mxu0 %v180_v40  ;;  %264 = vmatpush.msra.mxu1 %v180_v40 }
  0xa9   :  { %207 = vmatpush.msra.mxu0 %v179_v41  ;;  %265 = vmatpush.msra.mxu1 %v179_v41 }
  0xaa   :  { %260 = vmatmul.msk.f32.vlgmr.msra.gmra.mxu0 %vm185_vm12, %v183_v42  ;;  %261 = vmatmul.msk.f32.vlgmr.msra.gmra.mxu1 %vm185_vm12, %v184_v43 }
 0x127   :  { %v209_v47 = vpop.f32.mrf.mxu0  ;;  %v212_v48 = vpop.f32.mrf.mxu1 }
 0x128   :  { %215 = vst [vmem:[%s476_s6] sm:$0xff] %v209_v47  ;;  %v223_v49 = vsel %vm222_vm14, %v209_v47, 0.0  ;;  %v224_v50 = vsel %vm222_vm14, %v212_v48, 0.0 }
 0x129   :  { %227 = vadd.xlane.f32.xlu2 %v223_v49  ;;  %v238_v51 = vmul.f32 %v223_v49, %v223_v49  ;;  %216 = vst [vmem:[%s476_s6 + $0x8] sm:$0xff] %v212_v48  ;;  %229 = vadd.xlane.f32.xlu0 %v224_v50  ;;  %v239_v52 = vmul.f32 %v224_v50, %v224_v50 }
 0x12b   :  { %240 = vadd.xlane.f32.xlu1 %v238_v51 }
 0x131   :  { %242 = vadd.xlane.f32.xlu2 %v239_v52 }
 0x19c   :  { %v228_v55 = vpop.xlane.xlu2 %227  ;;  %v230_v57 = vpop.xlane.xlu0 %229 }
 0x19d   :  { %v231_v58 = vadd.f32 %v228_v55, %v225_v53  ;;  %v232_v59 = vadd.f32 %v230_v57, %v226_v54 }
 0x19e   :  { %v241_v60 = vpop.xlane.xlu1 %240 }
 0x19f   :  { %234 = vst.msk [vmem:[%s474_s7] sm:$0xff] %vm30_vm13, %v231_v58  ;;  %v244_v61 = vadd.f32 %v241_v60, %v236_v56 }
 0x1a0   :  { %235 = vst.msk [vmem:[%s474_s7 + $0x8] sm:$0xff] %vm30_vm13, %v232_v59 }
 0x1a1   :  { %246 = vst.msk [vmem:[%s475_s8] sm:$0xff] %vm30_vm13, %v244_v61 }
 0x1a4   :  { %v243_v63 = vpop.xlane.xlu2 %242 }
 0x1a5   :  { %v245_v0 = vadd.f32 %v243_v63, %v237_v62 }
 0x1a7   :  { %247 = vst.msk [vmem:[%s475_s8 + $0x8] sm:$0xff] %vm30_vm13, %v245_v0 }

</bundles_post_ra>
